<compile_context>
chip_gen: v5e
topology: v5e:2x2
jax: 0.10.0
libtpu: 0.0.40
codegen_flags: <defaults>
</compile_context>

<pallas_src>
import functools

import jax
import jax.numpy as jnp
from jax.experimental import pallas as pl
from jax.experimental.pallas import tpu as pltpu


# ------------------------------- helpers -------------------------------------
def _pick_row_tile(n, max_tile=512):
    """Largest multiple-of-8 row tile (<= max_tile) dividing n."""
    for cand in (512, 256, 128, 64, 32, 16, 8):
        if cand <= max_tile and cand <= n and n % cand == 0:
            return cand
    return n


def _pick_chunk(t, max_chunk=16):
    """Largest chunk <= max_chunk dividing t (timesteps per grid step)."""
    for cand in range(min(t, max_chunk), 0, -1):
        if t % cand == 0:
            return cand
    return 1


# ------------------------ encoder (nn.Linear) kernel --------------------------
def encoder_kernel(x_ref, we_ref, be_ref, emb_ref):
    # x: (rt, ntoken) f32, we: (ntoken, ninp) bf16 -> emb: (rt, ninp) f32
    emb_ref[...] = jnp.dot(x_ref[...].astype(jnp.bfloat16), we_ref[...],
                           preferred_element_type=jnp.float32) + be_ref[...]


def encode_tokens(x_flat, w_enc, b_enc):
    """(T*Bp, ntoken) -> (T*Bp, ninp): encoder for all timesteps at once."""
    n, ntoken = x_flat.shape
    ninp = w_enc.shape[1]
    rt = _pick_row_tile(n)
    # TODO(synk): for a real vocab (ntoken ~10k+) tile the ntoken contraction
    # axis (K tiles + f32 accumulator) or use an embedding gather.
    return pl.pallas_call(
        encoder_kernel,
        out_shape=jax.ShapeDtypeStruct((n, ninp), jnp.float32),
        grid_spec=pltpu.PrefetchScalarGridSpec(
            num_scalar_prefetch=0,
            grid=(n // rt,),
            in_specs=[
                pl.BlockSpec((rt, ntoken), lambda i: (i, 0)),
                pl.BlockSpec(w_enc.shape, lambda i: (0, 0)),
                pl.BlockSpec(b_enc.shape, lambda i: (0, 0)),
            ],
            out_specs=pl.BlockSpec((rt, ninp), lambda i: (i, 0)),
        ),
        compiler_params=pltpu.CompilerParams(
            dimension_semantics=("parallel",)),
    )(x_flat, w_enc, b_enc)


# --------------------------- recurrent core kernel ----------------------------
def scoff_rnn_kernel(x_ref, h0_ref, c0_ref, wx_ref, bx_ref, wh_ref,
                     out_ref, hT_ref, cT_ref, gx_scr):
    """One (block k, time-chunk t) grid step of the block-diagonal LSTM.

    x_ref  : (TT*Bp, nin)     layer input rows for this chunk (f32)
    h0/c0  : (Bp, bs)         initial state for this block (f32)
    wx_ref : (1, nin, 4*bs)   this block's input-to-hidden weights (bf16)
    bx_ref : (1, 1, 4*bs)     this block's gate bias (f32)
    wh_ref : (1, bs, 4*bs)    this block's hidden-to-hidden weights (bf16)
    out    : (TT*Bp, bs)      per-step hidden output for this block
    hT/cT  : (Bp, bs)         resident state carry across the chunk axis
    gx_scr : (TT*Bp, 4*bs)    VMEM scratch for the hoisted x-gates
    """
    chunk = pl.program_id(1)

    @pl.when(chunk == 0)
    def _():
        hT_ref[...] = h0_ref[...]
        cT_ref[...] = c0_ref[...]

    wx = wx_ref[0]                       # (nin, 4*bs) bf16
    wh = wh_ref[0]                       # (bs, 4*bs)  bf16
    bx = bx_ref[0]                       # (1, 4*bs)   f32
    bs = wh.shape[0]
    bp = h0_ref.shape[0]
    tt_steps = x_ref.shape[0] // bp

    # Input-to-hidden matmul hoisted out of the time loop: one big MXU matmul
    # for the whole chunk, result kept in VMEM scratch (never touches HBM).
    gx_scr[...] = jnp.dot(x_ref[...].astype(jnp.bfloat16), wx,
                          preferred_element_type=jnp.float32) + bx

    def step(tt, carry):
        h, c = carry                     # (Bp, bs) f32, kept in vregs
        r0 = pl.multiple_of(tt * bp, bp)
        gates = gx_scr[pl.ds(r0, bp), :] + jnp.dot(
            h.astype(wh.dtype), wh, preferred_element_type=jnp.float32)
        # Per-block gate column order is [i | f | g | o], each bs wide.
        i_g = jax.nn.sigmoid(gates[:, 0 * bs:1 * bs])
        f_g = jax.nn.sigmoid(gates[:, 1 * bs:2 * bs])
        g_g = jnp.tanh(gates[:, 2 * bs:3 * bs])
        o_g = jax.nn.sigmoid(gates[:, 3 * bs:4 * bs])
        c_new = f_g * c + i_g * g_g
        h_new = o_g * jnp.tanh(c_new)
        out_ref[pl.ds(r0, bp), :] = h_new
        return h_new, c_new

    h_fin, c_fin = jax.lax.fori_loop(
        0, tt_steps, step, (hT_ref[...], cT_ref[...]), unroll=True)

    # State writeback once per chunk (not per timestep).
    hT_ref[...] = h_fin
    cT_ref[...] = c_fin


def run_block_rnn(x2d, h0, c0, wx_blk, bx_blk, wh_blk):
    """x2d: (T*Bp, nin) time-major flat; h0/c0: (Bp, nhid);
    wx_blk: (num_blocks, nin, 4*bs); bx_blk: (num_blocks, 1, 4*bs);
    wh_blk: (num_blocks, bs, 4*bs).
    Returns (out2d (T*Bp, nhid), hT (Bp, nhid), cT (Bp, nhid))."""
    n_rows, nin = x2d.shape
    bp, nhid = h0.shape
    t_steps = n_rows // bp
    num_blocks = wh_blk.shape[0]
    bs = nhid // num_blocks
    # Lane-tiling requirement of the block-column output layout.
    # TODO(synk): support block_size not a multiple of 128 via per-block
    # padded columns instead of direct column slicing.
    assert bs % 128 == 0 or num_blocks == 1, \
        "block_size (nhid//num_blocks) must be a multiple of 128"

    tt = _pick_chunk(t_steps)
    n_chunks = t_steps // tt
    rows = tt * bp

    return pl.pallas_call(
        scoff_rnn_kernel,
        out_shape=(
            jax.ShapeDtypeStruct((n_rows, nhid), jnp.float32),
            jax.ShapeDtypeStruct((bp, nhid), jnp.float32),
            jax.ShapeDtypeStruct((bp, nhid), jnp.float32),
        ),
        grid_spec=pltpu.PrefetchScalarGridSpec(
            num_scalar_prefetch=0,
            # Block axis is embarrassingly parallel (block-diagonal wh) ->
            # "parallel" lets v7x's two TensorCores split the blocks; time
            # chunks stay "arbitrary" (sequential state carry).
            grid=(num_blocks, n_chunks),
            in_specs=[
                pl.BlockSpec((rows, nin), lambda k, t: (t, 0)),
                pl.BlockSpec((bp, bs), lambda k, t: (0, k)),
                pl.BlockSpec((bp, bs), lambda k, t: (0, k)),
                pl.BlockSpec((1, nin, 4 * bs), lambda k, t: (k, 0, 0)),
                pl.BlockSpec((1, 1, 4 * bs), lambda k, t: (k, 0, 0)),
                pl.BlockSpec((1, bs, 4 * bs), lambda k, t: (k, 0, 0)),
            ],
            out_specs=(
                pl.BlockSpec((rows, bs), lambda k, t: (t, k)),
                pl.BlockSpec((bp, bs), lambda k, t: (0, k)),
                pl.BlockSpec((bp, bs), lambda k, t: (0, k)),
            ),
            scratch_shapes=[pltpu.VMEM((rows, 4 * bs), jnp.float32)],
        ),
        compiler_params=pltpu.CompilerParams(
            dimension_semantics=("parallel", "arbitrary")),
    )(x2d, h0, c0, wx_blk, bx_blk, wh_blk)


# ------------------------------ parameter setup -------------------------------
def init_params(key, ntoken, ninp, nhid, num_blocks, nlayers):
    bs = nhid // num_blocks
    ks = jax.random.split(key, 1 + 3 * nlayers)

    # encoder: nn.Linear(ntoken, ninp); weights kept in bf16 for the MXU.
    w_enc = (0.1 * jax.random.normal(ks[0], (ntoken, ninp), jnp.float32)
             ).astype(jnp.bfloat16)
    b_enc = jnp.zeros((1, ninp), jnp.float32)

    layers = []
    for l in range(nlayers):
        kx, kh, kb = ks[1 + 3 * l], ks[2 + 3 * l], ks[3 + 3 * l]
        nin = ninp if l == 0 else nhid
        scale_x = float(nin) ** -0.5
        scale_h = float(bs) ** -0.5
        # Per-block weights (BlocksCore.blockify_params compact form).
        # Per-block gate column order is [i | f | g | o], each bs wide.
        wx_blk = (scale_x * jax.random.normal(
            kx, (num_blocks, nin, 4 * bs), jnp.float32)).astype(jnp.bfloat16)
        wh_blk = (scale_h * jax.random.normal(
            kh, (num_blocks, bs, 4 * bs), jnp.float32)).astype(jnp.bfloat16)
        bx_blk = scale_h * jax.random.normal(
            kb, (num_blocks, 1, 4 * bs), jnp.float32)
        layers.append((wx_blk, wh_blk, bx_blk))

    return (w_enc, b_enc), layers


# --------------------------------- forward ------------------------------------
@functools.partial(jax.jit, static_argnames=("num_blocks",))
def rnn_model_forward(inp, hidden, enc_params, layer_params, num_blocks):
    """Mirrors RNNModel.forward (eval mode).

    inp    : (T, B, ntoken)
    hidden : (h, c), each (nlayers, B, nhid)
    returns (dec_, (h_new, c_new), extra_loss, block_mask, template_attn,
             entropy)
    """
    T, B, ntoken = inp.shape
    h_all, c_all = hidden
    nlayers = h_all.shape[0]
    nhid = h_all.shape[-1]

    w_enc, b_enc = enc_params

    # Pad batch to a multiple of 8 so vreg sublanes / MXU rows are occupied.
    B_pad = max(8, ((B + 7) // 8) * 8)
    pad_b = B_pad - B
    inp_p = jnp.pad(inp, ((0, 0), (0, pad_b), (0, 0)))
    h_p = jnp.pad(h_all, ((0, 0), (0, pad_b), (0, 0)))
    c_p = jnp.pad(c_all, ((0, 0), (0, pad_b), (0, 0)))
    N = T * B_pad

    # encoder + dropout(eval) once for all timesteps, time-major flat rows.
    layer_in = encode_tokens(inp_p.reshape(N, ntoken), w_enc, b_enc)

    new_h, new_c = [], []
    out2d = layer_in
    for l in range(nlayers):
        wx_blk, wh_blk, bx_blk = layer_params[l]
        out2d, hT, cT = run_block_rnn(layer_in, h_p[l], c_p[l],
                                      wx_blk, bx_blk, wh_blk)
        layer_in = out2d
        new_h.append(hT[:B])
        new_c.append(cT[:B])

    new_hidden = (jnp.stack(new_h), jnp.stack(new_c))

    output = out2d.reshape(T, B_pad, nhid)[:, :B, :]   # drop() == identity
    dec_ = output.reshape(T * B, nhid).reshape(T, B, nhid)

    extra_loss = 0.0
    entropy = jnp.float32(0.0)
    # TODO(synk): bmask comes from BlocksCore top-k gating; with
    # topk == num_blocks every block updates every step -> mask of ones.
    block_mask = jnp.ones((T, B, num_blocks), jnp.float32)
    template_attn = None
    return dec_, new_hidden, extra_loss, block_mask, template_attn, entropy


# ----------------------------------- main -------------------------------------
if __name__ == "__main__":
    # Small config consistent with the module's constructor semantics.
    T, B = 8, 2
    ntoken, ninp, nhid = 32, 128, 256
    num_blocks, nlayers = 2, 1          # block_size = nhid // num_blocks = 128

    key = jax.random.PRNGKey(0)
    k_inp, k_par = jax.random.split(key)

    inp = jax.random.normal(k_inp, (T, B, ntoken), jnp.float32)
    hidden = (jnp.zeros((nlayers, B, nhid), jnp.float32),
              jnp.zeros((nlayers, B, nhid), jnp.float32))

    enc_params, layer_params = init_params(
        k_par, ntoken, ninp, nhid, num_blocks, nlayers)

    dec_, new_hidden, extra_loss, block_mask, template_attn, entropy = (
        rnn_model_forward(inp, hidden, enc_params, tuple(layer_params),
                          num_blocks=num_blocks))

    jax.block_until_ready(dec_)
    jax.block_until_ready(new_hidden)

    assert dec_.shape == (T, B, nhid)
    assert new_hidden[0].shape == (nlayers, B, nhid)
    assert new_hidden[1].shape == (nlayers, B, nhid)
    assert block_mask.shape == (T, B, num_blocks)
    assert bool(jnp.all(jnp.isfinite(dec_)))
    assert bool(jnp.all(jnp.isfinite(new_hidden[0])))
    assert bool(jnp.all(jnp.isfinite(new_hidden[1])))

    print("KERNEL_OK")
</pallas_src>

<mosaic_0001>
module attributes {stable_mosaic.version = 11 : i64} {
  func.func @encoder_kernel(%arg0: i32, %arg1: memref<64x32xf32, #tpu.memory_space<vmem>>, %arg2: memref<32x128xbf16, #tpu.memory_space<vmem>>, %arg3: memref<1x128xf32, #tpu.memory_space<vmem>>, %arg4: memref<64x128xf32, #tpu.memory_space<vmem>>) attributes {dimension_semantics = [#tpu.dimension_semantics<parallel>], iteration_bounds = array<i64: 1>, scalar_prefetch = 0 : i64, scratch_operands = 0 : i64, tpu.core_type = #tpu.core_type<tc>, window_params = [{transform_indices = @transform_0, window_bounds = array<i64: 64, 32>}, {pipeline_mode = #tpu.pipeline_mode<synchronous>, transform_indices = @transform_1, window_bounds = array<i64: 32, 128>}, {pipeline_mode = #tpu.pipeline_mode<synchronous>, transform_indices = @transform_2, window_bounds = array<i64: 1, 128>}, {transform_indices = @transform_3, window_bounds = array<i64: 64, 128>}]} {
    %c0 = arith.constant 0 : index
    %c0_0 = arith.constant 0 : index
    %0 = vector.load %arg1[%c0, %c0_0] : memref<64x32xf32, #tpu.memory_space<vmem>>, vector<64x32xf32>
    %1 = arith.truncf %0 : vector<64x32xf32> to vector<64x32xbf16>
    %c0_1 = arith.constant 0 : index
    %c0_2 = arith.constant 0 : index
    %2 = vector.load %arg2[%c0_1, %c0_2] : memref<32x128xbf16, #tpu.memory_space<vmem>>, vector<32x128xbf16>
    %cst = arith.constant dense<0.000000e+00> : vector<64x128xf32>
    %3 = tpu.matmul %1, %2, %cst {dimension_numbers = #tpu.dot_dimension_numbers<[1], [0], [0], [1], [0, 0, 1, 1], [], []>} : vector<64x32xbf16>, vector<32x128xbf16>, vector<64x128xf32> -> vector<64x128xf32>
    %c0_3 = arith.constant 0 : index
    %c0_4 = arith.constant 0 : index
    %4 = vector.load %arg3[%c0_3, %c0_4] : memref<1x128xf32, #tpu.memory_space<vmem>>, vector<1x128xf32>
    %5 = vector.broadcast %4 : vector<1x128xf32> to vector<64x128xf32>
    %6 = arith.addf %3, %5 : vector<64x128xf32>
    %c0_5 = arith.constant 0 : index
    %c0_6 = arith.constant 0 : index
    %7 = vector.load %arg4[%c0_5, %c0_6] : memref<64x128xf32, #tpu.memory_space<vmem>>, vector<64x128xf32>
    tpu.vector_store %arg4[%c0_5, %c0_6], %6 {strides = array<i32>} : memref<64x128xf32, #tpu.memory_space<vmem>>, vector<64x128xf32>,
    return
  }
  func.func @transform_0(%arg0: i32) -> (i32, i32) {
    %c0_i32 = arith.constant 0 : i32
    %c0_i32_0 = arith.constant 0 : i32
    return %arg0, %c0_i32 : i32, i32
  }
  func.func @transform_1(%arg0: i32) -> (i32, i32) {
    %c0_i32 = arith.constant 0 : i32
    %c0_i32_0 = arith.constant 0 : i32
    %c0_i32_1 = arith.constant 0 : i32
    return %c0_i32, %c0_i32_0 : i32, i32
  }
  func.func @transform_2(%arg0: i32) -> (i32, i32) {
    %c0_i32 = arith.constant 0 : i32
    %c0_i32_0 = arith.constant 0 : i32
    %c0_i32_1 = arith.constant 0 : i32
    return %c0_i32, %c0_i32_0 : i32, i32
  }
  func.func @transform_3(%arg0: i32) -> (i32, i32) {
    %c0_i32 = arith.constant 0 : i32
    %c0_i32_0 = arith.constant 0 : i32
    return %arg0, %c0_i32 : i32, i32
  }
}

module attributes {stable_mosaic.version = 11 : i64} {
  func.func @scoff_rnn_kernel(%arg0: i32, %arg1: i32, %arg2: memref<64x128xf32, #tpu.memory_space<vmem>>, %arg3: memref<8x128xf32, #tpu.memory_space<vmem>>, %arg4: memref<8x128xf32, #tpu.memory_space<vmem>>, %arg5: memref<1x128x512xbf16, #tpu.memory_space<vmem>>, %arg6: memref<1x1x512xf32, #tpu.memory_space<vmem>>, %arg7: memref<1x128x512xbf16, #tpu.memory_space<vmem>>, %arg8: memref<64x128xf32, #tpu.memory_space<vmem>>, %arg9: memref<8x128xf32, #tpu.memory_space<vmem>>, %arg10: memref<8x128xf32, #tpu.memory_space<vmem>>, %arg11: memref<64x512xf32, #tpu.memory_space<vmem>>) attributes {dimension_semantics = [#tpu.dimension_semantics<parallel>, #tpu.dimension_semantics<arbitrary>], iteration_bounds = array<i64: 2, 1>, scalar_prefetch = 0 : i64, scratch_operands = 1 : i64, tpu.core_type = #tpu.core_type<tc>, window_params = [{transform_indices = @transform_0, window_bounds = array<i64: 64, 128>}, {transform_indices = @transform_1, window_bounds = array<i64: 8, 128>}, {transform_indices = @transform_2, window_bounds = array<i64: 8, 128>}, {transform_indices = @transform_3, window_bounds = array<i64: 1, 128, 512>}, {transform_indices = @transform_4, window_bounds = array<i64: 1, 1, 512>}, {transform_indices = @transform_5, window_bounds = array<i64: 1, 128, 512>}, {transform_indices = @transform_6, window_bounds = array<i64: 64, 128>}, {transform_indices = @transform_7, window_bounds = array<i64: 8, 128>}, {transform_indices = @transform_8, window_bounds = array<i64: 8, 128>}]} {
    %c0_i32 = arith.constant 0 : i32
    %0 = arith.cmpi eq, %arg1, %c0_i32 : i32
    %1 = arith.extui %0 : i1 to i32
    %c0_i32_0 = arith.constant 0 : i32
    %2 = arith.cmpi ne, %1, %c0_i32_0 : i32
    scf.if %2 {
      %c0_78 = arith.constant 0 : index
      %c0_79 = arith.constant 0 : index
      %291 = vector.load %arg3[%c0_78, %c0_79] : memref<8x128xf32, #tpu.memory_space<vmem>>, vector<8x128xf32>
      %c0_80 = arith.constant 0 : index
      %c0_81 = arith.constant 0 : index
      %292 = vector.load %arg9[%c0_80, %c0_81] : memref<8x128xf32, #tpu.memory_space<vmem>>, vector<8x128xf32>
      tpu.vector_store %arg9[%c0_80, %c0_81], %291 {strides = array<i32>} : memref<8x128xf32, #tpu.memory_space<vmem>>, vector<8x128xf32>,
      %c0_82 = arith.constant 0 : index
      %c0_83 = arith.constant 0 : index
      %293 = vector.load %arg4[%c0_82, %c0_83] : memref<8x128xf32, #tpu.memory_space<vmem>>, vector<8x128xf32>
      %c0_84 = arith.constant 0 : index
      %c0_85 = arith.constant 0 : index
      %294 = vector.load %arg10[%c0_84, %c0_85] : memref<8x128xf32, #tpu.memory_space<vmem>>, vector<8x128xf32>
      tpu.vector_store %arg10[%c0_84, %c0_85], %293 {strides = array<i32>} : memref<8x128xf32, #tpu.memory_space<vmem>>, vector<8x128xf32>,
    } else {
    }
    %c0 = arith.constant 0 : index
    %c0_1 = arith.constant 0 : index
    %c0_2 = arith.constant 0 : index
    %3 = vector.load %arg5[%c0, %c0_1, %c0_2] : memref<1x128x512xbf16, #tpu.memory_space<vmem>>, vector<1x128x512xbf16>
    %4 = vector.shape_cast %3 : vector<1x128x512xbf16> to vector<128x512xbf16>
    %c0_3 = arith.constant 0 : index
    %c0_4 = arith.constant 0 : index
    %c0_5 = arith.constant 0 : index
    %5 = vector.load %arg7[%c0_3, %c0_4, %c0_5] : memref<1x128x512xbf16, #tpu.memory_space<vmem>>, vector<1x128x512xbf16>
    %6 = vector.shape_cast %5 : vector<1x128x512xbf16> to vector<128x512xbf16>
    %c0_6 = arith.constant 0 : index
    %c0_7 = arith.constant 0 : index
    %c0_8 = arith.constant 0 : index
    %7 = vector.load %arg6[%c0_6, %c0_7, %c0_8] : memref<1x1x512xf32, #tpu.memory_space<vmem>>, vector<1x1x512xf32>
    %8 = vector.shape_cast %7 : vector<1x1x512xf32> to vector<1x512xf32>
    %c0_9 = arith.constant 0 : index
    %c0_10 = arith.constant 0 : index
    %9 = vector.load %arg2[%c0_9, %c0_10] : memref<64x128xf32, #tpu.memory_space<vmem>>, vector<64x128xf32>
    %10 = arith.truncf %9 : vector<64x128xf32> to vector<64x128xbf16>
    %cst = arith.constant dense<0.000000e+00> : vector<64x512xf32>
    %11 = tpu.matmul %10, %4, %cst {dimension_numbers = #tpu.dot_dimension_numbers<[1], [0], [0], [1], [0, 0, 1, 1], [], []>} : vector<64x128xbf16>, vector<128x512xbf16>, vector<64x512xf32> -> vector<64x512xf32>
    %12 = vector.broadcast %8 : vector<1x512xf32> to vector<64x512xf32>
    %13 = arith.addf %11, %12 : vector<64x512xf32>
    %c0_11 = arith.constant 0 : index
    %c0_12 = arith.constant 0 : index
    %14 = vector.load %arg11[%c0_11, %c0_12] : memref<64x512xf32, #tpu.memory_space<vmem>>, vector<64x512xf32>
    tpu.vector_store %arg11[%c0_11, %c0_12], %13 {strides = array<i32>} : memref<64x512xf32, #tpu.memory_space<vmem>>, vector<64x512xf32>,
    %c0_13 = arith.constant 0 : index
    %c0_14 = arith.constant 0 : index
    %15 = vector.load %arg9[%c0_13, %c0_14] : memref<8x128xf32, #tpu.memory_space<vmem>>, vector<8x128xf32>
    %c0_15 = arith.constant 0 : index
    %c0_16 = arith.constant 0 : index
    %16 = vector.load %arg10[%c0_15, %c0_16] : memref<8x128xf32, #tpu.memory_space<vmem>>, vector<8x128xf32>
    %c0_i32_17 = arith.constant 0 : i32
    %c8_i32 = arith.constant 8 : i32
    %17 = arith.muli %c0_i32_17, %c8_i32 : i32
    %18 = tpu.assume_multiple %17, 8 : i32
    %19 = arith.index_cast %18 : i32 to index
    %c0_18 = arith.constant 0 : index
    %20 = vector.load %arg11[%19, %c0_18] : memref<64x512xf32, #tpu.memory_space<vmem>>, vector<8x512xf32>
    %21 = arith.truncf %15 : vector<8x128xf32> to vector<8x128xbf16>
    %cst_19 = arith.constant dense<0.000000e+00> : vector<8x512xf32>
    %22 = tpu.matmul %21, %6, %cst_19 {dimension_numbers = #tpu.dot_dimension_numbers<[1], [0], [0], [1], [0, 0, 1, 1], [], []>} : vector<8x128xbf16>, vector<128x512xbf16>, vector<8x512xf32> -> vector<8x512xf32>
    %23 = arith.addf %20, %22 : vector<8x512xf32>
    %24 = vector.extract_strided_slice %23 {offsets = [0, 0], sizes = [8, 128], strides = [1, 1]} : vector<8x512xf32> to vector<8x128xf32>
    %25 = arith.negf %24 : vector<8x128xf32>
    %26 = math.exp %25 : vector<8x128xf32>
    %cst_20 = arith.constant 1.000000e+00 : f32
    %27 = vector.broadcast %cst_20 : f32 to vector<8x128xf32>
    %28 = arith.addf %27, %26 : vector<8x128xf32>
    %29 = arith.divf %27, %28 : vector<8x128xf32>
    %30 = vector.extract_strided_slice %23 {offsets = [0, 128], sizes = [8, 128], strides = [1, 1]} : vector<8x512xf32> to vector<8x128xf32>
    %31 = arith.negf %30 : vector<8x128xf32>
    %32 = math.exp %31 : vector<8x128xf32>
    %cst_21 = arith.constant 1.000000e+00 : f32
    %33 = vector.broadcast %cst_21 : f32 to vector<8x128xf32>
    %34 = arith.addf %33, %32 : vector<8x128xf32>
    %35 = arith.divf %33, %34 : vector<8x128xf32>
    %36 = vector.extract_strided_slice %23 {offsets = [0, 256], sizes = [8, 128], strides = [1, 1]} : vector<8x512xf32> to vector<8x128xf32>
    %37 = math.tanh %36 : vector<8x128xf32>
    %38 = vector.extract_strided_slice %23 {offsets = [0, 384], sizes = [8, 128], strides = [1, 1]} : vector<8x512xf32> to vector<8x128xf32>
    %39 = arith.negf %38 : vector<8x128xf32>
    %40 = math.exp %39 : vector<8x128xf32>
    %cst_22 = arith.constant 1.000000e+00 : f32
    %41 = vector.broadcast %cst_22 : f32 to vector<8x128xf32>
    %42 = arith.addf %41, %40 : vector<8x128xf32>
    %43 = arith.divf %41, %42 : vector<8x128xf32>
    %44 = arith.mulf %35, %16 : vector<8x128xf32>
    %45 = arith.mulf %29, %37 : vector<8x128xf32>
    %46 = arith.addf %44, %45 : vector<8x128xf32>
    %47 = math.tanh %46 : vector<8x128xf32>
    %48 = arith.mulf %43, %47 : vector<8x128xf32>
    %49 = arith.index_cast %18 : i32 to index
    %c0_23 = arith.constant 0 : index
    %50 = vector.load %arg8[%49, %c0_23] : memref<64x128xf32, #tpu.memory_space<vmem>>, vector<8x128xf32>
    tpu.vector_store %arg8[%49, %c0_23], %48 {strides = array<i32>} : memref<64x128xf32, #tpu.memory_space<vmem>>, vector<8x128xf32>,
    %c1_i32 = arith.constant 1 : i32
    %c8_i32_24 = arith.constant 8 : i32
    %51 = arith.muli %c1_i32, %c8_i32_24 : i32
    %52 = tpu.assume_multiple %51, 8 : i32
    %53 = arith.index_cast %52 : i32 to index
    %c0_25 = arith.constant 0 : index
    %54 = vector.load %arg11[%53, %c0_25] : memref<64x512xf32, #tpu.memory_space<vmem>>, vector<8x512xf32>
    %55 = arith.truncf %48 : vector<8x128xf32> to vector<8x128xbf16>
    %cst_26 = arith.constant dense<0.000000e+00> : vector<8x512xf32>
    %56 = tpu.matmul %55, %6, %cst_26 {dimension_numbers = #tpu.dot_dimension_numbers<[1], [0], [0], [1], [0, 0, 1, 1], [], []>} : vector<8x128xbf16>, vector<128x512xbf16>, vector<8x512xf32> -> vector<8x512xf32>
    %57 = arith.addf %54, %56 : vector<8x512xf32>
    %58 = vector.extract_strided_slice %57 {offsets = [0, 0], sizes = [8, 128], strides = [1, 1]} : vector<8x512xf32> to vector<8x128xf32>
    %59 = arith.negf %58 : vector<8x128xf32>
    %60 = math.exp %59 : vector<8x128xf32>
    %cst_27 = arith.constant 1.000000e+00 : f32
    %61 = vector.broadcast %cst_27 : f32 to vector<8x128xf32>
    %62 = arith.addf %61, %60 : vector<8x128xf32>
    %63 = arith.divf %61, %62 : vector<8x128xf32>
    %64 = vector.extract_strided_slice %57 {offsets = [0, 128], sizes = [8, 128], strides = [1, 1]} : vector<8x512xf32> to vector<8x128xf32>
    %65 = arith.negf %64 : vector<8x128xf32>
    %66 = math.exp %65 : vector<8x128xf32>
    %cst_28 = arith.constant 1.000000e+00 : f32
    %67 = vector.broadcast %cst_28 : f32 to vector<8x128xf32>
    %68 = arith.addf %67, %66 : vector<8x128xf32>
    %69 = arith.divf %67, %68 : vector<8x128xf32>
    %70 = vector.extract_strided_slice %57 {offsets = [0, 256], sizes = [8, 128], strides = [1, 1]} : vector<8x512xf32> to vector<8x128xf32>
    %71 = math.tanh %70 : vector<8x128xf32>
    %72 = vector.extract_strided_slice %57 {offsets = [0, 384], sizes = [8, 128], strides = [1, 1]} : vector<8x512xf32> to vector<8x128xf32>
    %73 = arith.negf %72 : vector<8x128xf32>
    %74 = math.exp %73 : vector<8x128xf32>
    %cst_29 = arith.constant 1.000000e+00 : f32
    %75 = vector.broadcast %cst_29 : f32 to vector<8x128xf32>
    %76 = arith.addf %75, %74 : vector<8x128xf32>
    %77 = arith.divf %75, %76 : vector<8x128xf32>
    %78 = arith.mulf %69, %46 : vector<8x128xf32>
    %79 = arith.mulf %63, %71 : vector<8x128xf32>
    %80 = arith.addf %78, %79 : vector<8x128xf32>
    %81 = math.tanh %80 : vector<8x128xf32>
    %82 = arith.mulf %77, %81 : vector<8x128xf32>
    %83 = arith.index_cast %52 : i32 to index
    %c0_30 = arith.constant 0 : index
    %84 = vector.load %arg8[%83, %c0_30] : memref<64x128xf32, #tpu.memory_space<vmem>>, vector<8x128xf32>
    tpu.vector_store %arg8[%83, %c0_30], %82 {strides = array<i32>} : memref<64x128xf32, #tpu.memory_space<vmem>>, vector<8x128xf32>,
    %c2_i32 = arith.constant 2 : i32
    %c8_i32_31 = arith.constant 8 : i32
    %85 = arith.muli %c2_i32, %c8_i32_31 : i32
    %86 = tpu.assume_multiple %85, 8 : i32
    %87 = arith.index_cast %86 : i32 to index
    %c0_32 = arith.constant 0 : index
    %88 = vector.load %arg11[%87, %c0_32] : memref<64x512xf32, #tpu.memory_space<vmem>>, vector<8x512xf32>
    %89 = arith.truncf %82 : vector<8x128xf32> to vector<8x128xbf16>
    %cst_33 = arith.constant dense<0.000000e+00> : vector<8x512xf32>
    %90 = tpu.matmul %89, %6, %cst_33 {dimension_numbers = #tpu.dot_dimension_numbers<[1], [0], [0], [1], [0, 0, 1, 1], [], []>} : vector<8x128xbf16>, vector<128x512xbf16>, vector<8x512xf32> -> vector<8x512xf32>
    %91 = arith.addf %88, %90 : vector<8x512xf32>
    %92 = vector.extract_strided_slice %91 {offsets = [0, 0], sizes = [8, 128], strides = [1, 1]} : vector<8x512xf32> to vector<8x128xf32>
    %93 = arith.negf %92 : vector<8x128xf32>
    %94 = math.exp %93 : vector<8x128xf32>
    %cst_34 = arith.constant 1.000000e+00 : f32
    %95 = vector.broadcast %cst_34 : f32 to vector<8x128xf32>
    %96 = arith.addf %95, %94 : vector<8x128xf32>
    %97 = arith.divf %95, %96 : vector<8x128xf32>
    %98 = vector.extract_strided_slice %91 {offsets = [0, 128], sizes = [8, 128], strides = [1, 1]} : vector<8x512xf32> to vector<8x128xf32>
    %99 = arith.negf %98 : vector<8x128xf32>
    %100 = math.exp %99 : vector<8x128xf32>
    %cst_35 = arith.constant 1.000000e+00 : f32
    %101 = vector.broadcast %cst_35 : f32 to vector<8x128xf32>
    %102 = arith.addf %101, %100 : vector<8x128xf32>
    %103 = arith.divf %101, %102 : vector<8x128xf32>
    %104 = vector.extract_strided_slice %91 {offsets = [0, 256], sizes = [8, 128], strides = [1, 1]} : vector<8x512xf32> to vector<8x128xf32>
    %105 = math.tanh %104 : vector<8x128xf32>
    %106 = vector.extract_strided_slice %91 {offsets = [0, 384], sizes = [8, 128], strides = [1, 1]} : vector<8x512xf32> to vector<8x128xf32>
    %107 = arith.negf %106 : vector<8x128xf32>
    %108 = math.exp %107 : vector<8x128xf32>
    %cst_36 = arith.constant 1.000000e+00 : f32
    %109 = vector.broadcast %cst_36 : f32 to vector<8x128xf32>
    %110 = arith.addf %109, %108 : vector<8x128xf32>
    %111 = arith.divf %109, %110 : vector<8x128xf32>
    %112 = arith.mulf %103, %80 : vector<8x128xf32>
    %113 = arith.mulf %97, %105 : vector<8x128xf32>
    %114 = arith.addf %112, %113 : vector<8x128xf32>
    %115 = math.tanh %114 : vector<8x128xf32>
    %116 = arith.mulf %111, %115 : vector<8x128xf32>
    %117 = arith.index_cast %86 : i32 to index
    %c0_37 = arith.constant 0 : index
    %118 = vector.load %arg8[%117, %c0_37] : memref<64x128xf32, #tpu.memory_space<vmem>>, vector<8x128xf32>
    tpu.vector_store %arg8[%117, %c0_37], %116 {strides = array<i32>} : memref<64x128xf32, #tpu.memory_space<vmem>>, vector<8x128xf32>,
    %c3_i32 = arith.constant 3 : i32
    %c8_i32_38 = arith.constant 8 : i32
    %119 = arith.muli %c3_i32, %c8_i32_38 : i32
    %120 = tpu.assume_multiple %119, 8 : i32
    %121 = arith.index_cast %120 : i32 to index
    %c0_39 = arith.constant 0 : index
    %122 = vector.load %arg11[%121, %c0_39] : memref<64x512xf32, #tpu.memory_space<vmem>>, vector<8x512xf32>
    %123 = arith.truncf %116 : vector<8x128xf32> to vector<8x128xbf16>
    %cst_40 = arith.constant dense<0.000000e+00> : vector<8x512xf32>
    %124 = tpu.matmul %123, %6, %cst_40 {dimension_numbers = #tpu.dot_dimension_numbers<[1], [0], [0], [1], [0, 0, 1, 1], [], []>} : vector<8x128xbf16>, vector<128x512xbf16>, vector<8x512xf32> -> vector<8x512xf32>
    %125 = arith.addf %122, %124 : vector<8x512xf32>
    %126 = vector.extract_strided_slice %125 {offsets = [0, 0], sizes = [8, 128], strides = [1, 1]} : vector<8x512xf32> to vector<8x128xf32>
    %127 = arith.negf %126 : vector<8x128xf32>
    %128 = math.exp %127 : vector<8x128xf32>
    %cst_41 = arith.constant 1.000000e+00 : f32
    %129 = vector.broadcast %cst_41 : f32 to vector<8x128xf32>
    %130 = arith.addf %129, %128 : vector<8x128xf32>
    %131 = arith.divf %129, %130 : vector<8x128xf32>
    %132 = vector.extract_strided_slice %125 {offsets = [0, 128], sizes = [8, 128], strides = [1, 1]} : vector<8x512xf32> to vector<8x128xf32>
    %133 = arith.negf %132 : vector<8x128xf32>
    %134 = math.exp %133 : vector<8x128xf32>
    %cst_42 = arith.constant 1.000000e+00 : f32
    %135 = vector.broadcast %cst_42 : f32 to vector<8x128xf32>
    %136 = arith.addf %135, %134 : vector<8x128xf32>
    %137 = arith.divf %135, %136 : vector<8x128xf32>
    %138 = vector.extract_strided_slice %125 {offsets = [0, 256], sizes = [8, 128], strides = [1, 1]} : vector<8x512xf32> to vector<8x128xf32>
    %139 = math.tanh %138 : vector<8x128xf32>
    %140 = vector.extract_strided_slice %125 {offsets = [0, 384], sizes = [8, 128], strides = [1, 1]} : vector<8x512xf32> to vector<8x128xf32>
    %141 = arith.negf %140 : vector<8x128xf32>
    %142 = math.exp %141 : vector<8x128xf32>
    %cst_43 = arith.constant 1.000000e+00 : f32
    %143 = vector.broadcast %cst_43 : f32 to vector<8x128xf32>
    %144 = arith.addf %143, %142 : vector<8x128xf32>
    %145 = arith.divf %143, %144 : vector<8x128xf32>
    %146 = arith.mulf %137, %114 : vector<8x128xf32>
    %147 = arith.mulf %131, %139 : vector<8x128xf32>
    %148 = arith.addf %146, %147 : vector<8x128xf32>
    %149 = math.tanh %148 : vector<8x128xf32>
    %150 = arith.mulf %145, %149 : vector<8x128xf32>
    %151 = arith.index_cast %120 : i32 to index
    %c0_44 = arith.constant 0 : index
    %152 = vector.load %arg8[%151, %c0_44] : memref<64x128xf32, #tpu.memory_space<vmem>>, vector<8x128xf32>
    tpu.vector_store %arg8[%151, %c0_44], %150 {strides = array<i32>} : memref<64x128xf32, #tpu.memory_space<vmem>>, vector<8x128xf32>,
    %c4_i32 = arith.constant 4 : i32
    %c8_i32_45 = arith.constant 8 : i32
    %153 = arith.muli %c4_i32, %c8_i32_45 : i32
    %154 = tpu.assume_multiple %153, 8 : i32
    %155 = arith.index_cast %154 : i32 to index
    %c0_46 = arith.constant 0 : index
    %156 = vector.load %arg11[%155, %c0_46] : memref<64x512xf32, #tpu.memory_space<vmem>>, vector<8x512xf32>
    %157 = arith.truncf %150 : vector<8x128xf32> to vector<8x128xbf16>
    %cst_47 = arith.constant dense<0.000000e+00> : vector<8x512xf32>
    %158 = tpu.matmul %157, %6, %cst_47 {dimension_numbers = #tpu.dot_dimension_numbers<[1], [0], [0], [1], [0, 0, 1, 1], [], []>} : vector<8x128xbf16>, vector<128x512xbf16>, vector<8x512xf32> -> vector<8x512xf32>
    %159 = arith.addf %156, %158 : vector<8x512xf32>
    %160 = vector.extract_strided_slice %159 {offsets = [0, 0], sizes = [8, 128], strides = [1, 1]} : vector<8x512xf32> to vector<8x128xf32>
    %161 = arith.negf %160 : vector<8x128xf32>
    %162 = math.exp %161 : vector<8x128xf32>
    %cst_48 = arith.constant 1.000000e+00 : f32
    %163 = vector.broadcast %cst_48 : f32 to vector<8x128xf32>
    %164 = arith.addf %163, %162 : vector<8x128xf32>
    %165 = arith.divf %163, %164 : vector<8x128xf32>
    %166 = vector.extract_strided_slice %159 {offsets = [0, 128], sizes = [8, 128], strides = [1, 1]} : vector<8x512xf32> to vector<8x128xf32>
    %167 = arith.negf %166 : vector<8x128xf32>
    %168 = math.exp %167 : vector<8x128xf32>
    %cst_49 = arith.constant 1.000000e+00 : f32
    %169 = vector.broadcast %cst_49 : f32 to vector<8x128xf32>
    %170 = arith.addf %169, %168 : vector<8x128xf32>
    %171 = arith.divf %169, %170 : vector<8x128xf32>
    %172 = vector.extract_strided_slice %159 {offsets = [0, 256], sizes = [8, 128], strides = [1, 1]} : vector<8x512xf32> to vector<8x128xf32>
    %173 = math.tanh %172 : vector<8x128xf32>
    %174 = vector.extract_strided_slice %159 {offsets = [0, 384], sizes = [8, 128], strides = [1, 1]} : vector<8x512xf32> to vector<8x128xf32>
    %175 = arith.negf %174 : vector<8x128xf32>
    %176 = math.exp %175 : vector<8x128xf32>
    %cst_50 = arith.constant 1.000000e+00 : f32
    %177 = vector.broadcast %cst_50 : f32 to vector<8x128xf32>
    %178 = arith.addf %177, %176 : vector<8x128xf32>
    %179 = arith.divf %177, %178 : vector<8x128xf32>
    %180 = arith.mulf %171, %148 : vector<8x128xf32>
    %181 = arith.mulf %165, %173 : vector<8x128xf32>
    %182 = arith.addf %180, %181 : vector<8x128xf32>
    %183 = math.tanh %182 : vector<8x128xf32>
    %184 = arith.mulf %179, %183 : vector<8x128xf32>
    %185 = arith.index_cast %154 : i32 to index
    %c0_51 = arith.constant 0 : index
    %186 = vector.load %arg8[%185, %c0_51] : memref<64x128xf32, #tpu.memory_space<vmem>>, vector<8x128xf32>
    tpu.vector_store %arg8[%185, %c0_51], %184 {strides = array<i32>} : memref<64x128xf32, #tpu.memory_space<vmem>>, vector<8x128xf32>,
    %c5_i32 = arith.constant 5 : i32
    %c8_i32_52 = arith.constant 8 : i32
    %187 = arith.muli %c5_i32, %c8_i32_52 : i32
    %188 = tpu.assume_multiple %187, 8 : i32
    %189 = arith.index_cast %188 : i32 to index
    %c0_53 = arith.constant 0 : index
    %190 = vector.load %arg11[%189, %c0_53] : memref<64x512xf32, #tpu.memory_space<vmem>>, vector<8x512xf32>
    %191 = arith.truncf %184 : vector<8x128xf32> to vector<8x128xbf16>
    %cst_54 = arith.constant dense<0.000000e+00> : vector<8x512xf32>
    %192 = tpu.matmul %191, %6, %cst_54 {dimension_numbers = #tpu.dot_dimension_numbers<[1], [0], [0], [1], [0, 0, 1, 1], [], []>} : vector<8x128xbf16>, vector<128x512xbf16>, vector<8x512xf32> -> vector<8x512xf32>
    %193 = arith.addf %190, %192 : vector<8x512xf32>
    %194 = vector.extract_strided_slice %193 {offsets = [0, 0], sizes = [8, 128], strides = [1, 1]} : vector<8x512xf32> to vector<8x128xf32>
    %195 = arith.negf %194 : vector<8x128xf32>
    %196 = math.exp %195 : vector<8x128xf32>
    %cst_55 = arith.constant 1.000000e+00 : f32
    %197 = vector.broadcast %cst_55 : f32 to vector<8x128xf32>
    %198 = arith.addf %197, %196 : vector<8x128xf32>
    %199 = arith.divf %197, %198 : vector<8x128xf32>
    %200 = vector.extract_strided_slice %193 {offsets = [0, 128], sizes = [8, 128], strides = [1, 1]} : vector<8x512xf32> to vector<8x128xf32>
    %201 = arith.negf %200 : vector<8x128xf32>
    %202 = math.exp %201 : vector<8x128xf32>
    %cst_56 = arith.constant 1.000000e+00 : f32
    %203 = vector.broadcast %cst_56 : f32 to vector<8x128xf32>
    %204 = arith.addf %203, %202 : vector<8x128xf32>
    %205 = arith.divf %203, %204 : vector<8x128xf32>
    %206 = vector.extract_strided_slice %193 {offsets = [0, 256], sizes = [8, 128], strides = [1, 1]} : vector<8x512xf32> to vector<8x128xf32>
    %207 = math.tanh %206 : vector<8x128xf32>
    %208 = vector.extract_strided_slice %193 {offsets = [0, 384], sizes = [8, 128], strides = [1, 1]} : vector<8x512xf32> to vector<8x128xf32>
    %209 = arith.negf %208 : vector<8x128xf32>
    %210 = math.exp %209 : vector<8x128xf32>
    %cst_57 = arith.constant 1.000000e+00 : f32
    %211 = vector.broadcast %cst_57 : f32 to vector<8x128xf32>
    %212 = arith.addf %211, %210 : vector<8x128xf32>
    %213 = arith.divf %211, %212 : vector<8x128xf32>
    %214 = arith.mulf %205, %182 : vector<8x128xf32>
    %215 = arith.mulf %199, %207 : vector<8x128xf32>
    %216 = arith.addf %214, %215 : vector<8x128xf32>
    %217 = math.tanh %216 : vector<8x128xf32>
    %218 = arith.mulf %213, %217 : vector<8x128xf32>
    %219 = arith.index_cast %188 : i32 to index
    %c0_58 = arith.constant 0 : index
    %220 = vector.load %arg8[%219, %c0_58] : memref<64x128xf32, #tpu.memory_space<vmem>>, vector<8x128xf32>
    tpu.vector_store %arg8[%219, %c0_58], %218 {strides = array<i32>} : memref<64x128xf32, #tpu.memory_space<vmem>>, vector<8x128xf32>,
    %c6_i32 = arith.constant 6 : i32
    %c8_i32_59 = arith.constant 8 : i32
    %221 = arith.muli %c6_i32, %c8_i32_59 : i32
    %222 = tpu.assume_multiple %221, 8 : i32
    %223 = arith.index_cast %222 : i32 to index
    %c0_60 = arith.constant 0 : index
    %224 = vector.load %arg11[%223, %c0_60] : memref<64x512xf32, #tpu.memory_space<vmem>>, vector<8x512xf32>
    %225 = arith.truncf %218 : vector<8x128xf32> to vector<8x128xbf16>
    %cst_61 = arith.constant dense<0.000000e+00> : vector<8x512xf32>
    %226 = tpu.matmul %225, %6, %cst_61 {dimension_numbers = #tpu.dot_dimension_numbers<[1], [0], [0], [1], [0, 0, 1, 1], [], []>} : vector<8x128xbf16>, vector<128x512xbf16>, vector<8x512xf32> -> vector<8x512xf32>
    %227 = arith.addf %224, %226 : vector<8x512xf32>
    %228 = vector.extract_strided_slice %227 {offsets = [0, 0], sizes = [8, 128], strides = [1, 1]} : vector<8x512xf32> to vector<8x128xf32>
    %229 = arith.negf %228 : vector<8x128xf32>
    %230 = math.exp %229 : vector<8x128xf32>
    %cst_62 = arith.constant 1.000000e+00 : f32
    %231 = vector.broadcast %cst_62 : f32 to vector<8x128xf32>
    %232 = arith.addf %231, %230 : vector<8x128xf32>
    %233 = arith.divf %231, %232 : vector<8x128xf32>
    %234 = vector.extract_strided_slice %227 {offsets = [0, 128], sizes = [8, 128], strides = [1, 1]} : vector<8x512xf32> to vector<8x128xf32>
    %235 = arith.negf %234 : vector<8x128xf32>
    %236 = math.exp %235 : vector<8x128xf32>
    %cst_63 = arith.constant 1.000000e+00 : f32
    %237 = vector.broadcast %cst_63 : f32 to vector<8x128xf32>
    %238 = arith.addf %237, %236 : vector<8x128xf32>
    %239 = arith.divf %237, %238 : vector<8x128xf32>
    %240 = vector.extract_strided_slice %227 {offsets = [0, 256], sizes = [8, 128], strides = [1, 1]} : vector<8x512xf32> to vector<8x128xf32>
    %241 = math.tanh %240 : vector<8x128xf32>
    %242 = vector.extract_strided_slice %227 {offsets = [0, 384], sizes = [8, 128], strides = [1, 1]} : vector<8x512xf32> to vector<8x128xf32>
    %243 = arith.negf %242 : vector<8x128xf32>
    %244 = math.exp %243 : vector<8x128xf32>
    %cst_64 = arith.constant 1.000000e+00 : f32
    %245 = vector.broadcast %cst_64 : f32 to vector<8x128xf32>
    %246 = arith.addf %245, %244 : vector<8x128xf32>
    %247 = arith.divf %245, %246 : vector<8x128xf32>
    %248 = arith.mulf %239, %216 : vector<8x128xf32>
    %249 = arith.mulf %233, %241 : vector<8x128xf32>
    %250 = arith.addf %248, %249 : vector<8x128xf32>
    %251 = math.tanh %250 : vector<8x128xf32>
    %252 = arith.mulf %247, %251 : vector<8x128xf32>
    %253 = arith.index_cast %222 : i32 to index
    %c0_65 = arith.constant 0 : index
    %254 = vector.load %arg8[%253, %c0_65] : memref<64x128xf32, #tpu.memory_space<vmem>>, vector<8x128xf32>
    tpu.vector_store %arg8[%253, %c0_65], %252 {strides = array<i32>} : memref<64x128xf32, #tpu.memory_space<vmem>>, vector<8x128xf32>,
    %c7_i32 = arith.constant 7 : i32
    %c8_i32_66 = arith.constant 8 : i32
    %255 = arith.muli %c7_i32, %c8_i32_66 : i32
    %256 = tpu.assume_multiple %255, 8 : i32
    %257 = arith.index_cast %256 : i32 to index
    %c0_67 = arith.constant 0 : index
    %258 = vector.load %arg11[%257, %c0_67] : memref<64x512xf32, #tpu.memory_space<vmem>>, vector<8x512xf32>
    %259 = arith.truncf %252 : vector<8x128xf32> to vector<8x128xbf16>
    %cst_68 = arith.constant dense<0.000000e+00> : vector<8x512xf32>
    %260 = tpu.matmul %259, %6, %cst_68 {dimension_numbers = #tpu.dot_dimension_numbers<[1], [0], [0], [1], [0, 0, 1, 1], [], []>} : vector<8x128xbf16>, vector<128x512xbf16>, vector<8x512xf32> -> vector<8x512xf32>
    %261 = arith.addf %258, %260 : vector<8x512xf32>
    %262 = vector.extract_strided_slice %261 {offsets = [0, 0], sizes = [8, 128], strides = [1, 1]} : vector<8x512xf32> to vector<8x128xf32>
    %263 = arith.negf %262 : vector<8x128xf32>
    %264 = math.exp %263 : vector<8x128xf32>
    %cst_69 = arith.constant 1.000000e+00 : f32
    %265 = vector.broadcast %cst_69 : f32 to vector<8x128xf32>
    %266 = arith.addf %265, %264 : vector<8x128xf32>
    %267 = arith.divf %265, %266 : vector<8x128xf32>
    %268 = vector.extract_strided_slice %261 {offsets = [0, 128], sizes = [8, 128], strides = [1, 1]} : vector<8x512xf32> to vector<8x128xf32>
    %269 = arith.negf %268 : vector<8x128xf32>
    %270 = math.exp %269 : vector<8x128xf32>
    %cst_70 = arith.constant 1.000000e+00 : f32
    %271 = vector.broadcast %cst_70 : f32 to vector<8x128xf32>
    %272 = arith.addf %271, %270 : vector<8x128xf32>
    %273 = arith.divf %271, %272 : vector<8x128xf32>
    %274 = vector.extract_strided_slice %261 {offsets = [0, 256], sizes = [8, 128], strides = [1, 1]} : vector<8x512xf32> to vector<8x128xf32>
    %275 = math.tanh %274 : vector<8x128xf32>
    %276 = vector.extract_strided_slice %261 {offsets = [0, 384], sizes = [8, 128], strides = [1, 1]} : vector<8x512xf32> to vector<8x128xf32>
    %277 = arith.negf %276 : vector<8x128xf32>
    %278 = math.exp %277 : vector<8x128xf32>
    %cst_71 = arith.constant 1.000000e+00 : f32
    %279 = vector.broadcast %cst_71 : f32 to vector<8x128xf32>
    %280 = arith.addf %279, %278 : vector<8x128xf32>
    %281 = arith.divf %279, %280 : vector<8x128xf32>
    %282 = arith.mulf %273, %250 : vector<8x128xf32>
    %283 = arith.mulf %267, %275 : vector<8x128xf32>
    %284 = arith.addf %282, %283 : vector<8x128xf32>
    %285 = math.tanh %284 : vector<8x128xf32>
    %286 = arith.mulf %281, %285 : vector<8x128xf32>
    %287 = arith.index_cast %256 : i32 to index
    %c0_72 = arith.constant 0 : index
    %288 = vector.load %arg8[%287, %c0_72] : memref<64x128xf32, #tpu.memory_space<vmem>>, vector<8x128xf32>
    tpu.vector_store %arg8[%287, %c0_72], %286 {strides = array<i32>} : memref<64x128xf32, #tpu.memory_space<vmem>>, vector<8x128xf32>,
    %c8_i32_73 = arith.constant 8 : i32
    %c0_74 = arith.constant 0 : index
    %c0_75 = arith.constant 0 : index
    %289 = vector.load %arg9[%c0_74, %c0_75] : memref<8x128xf32, #tpu.memory_space<vmem>>, vector<8x128xf32>
    tpu.vector_store %arg9[%c0_74, %c0_75], %286 {strides = array<i32>} : memref<8x128xf32, #tpu.memory_space<vmem>>, vector<8x128xf32>,
    %c0_76 = arith.constant 0 : index
    %c0_77 = arith.constant 0 : index
    %290 = vector.load %arg10[%c0_76, %c0_77] : memref<8x128xf32, #tpu.memory_space<vmem>>, vector<8x128xf32>
    tpu.vector_store %arg10[%c0_76, %c0_77], %284 {strides = array<i32>} : memref<8x128xf32, #tpu.memory_space<vmem>>, vector<8x128xf32>,
    return
  }
  func.func @transform_0(%arg0: i32, %arg1: i32) -> (i32, i32) {
    %c0_i32 = arith.constant 0 : i32
    %c0_i32_0 = arith.constant 0 : i32
    return %arg1, %c0_i32 : i32, i32
  }
  func.func @transform_1(%arg0: i32, %arg1: i32) -> (i32, i32) {
    %c0_i32 = arith.constant 0 : i32
    %c0_i32_0 = arith.constant 0 : i32
    return %c0_i32, %arg0 : i32, i32
  }
  func.func @transform_2(%arg0: i32, %arg1: i32) -> (i32, i32) {
    %c0_i32 = arith.constant 0 : i32
    %c0_i32_0 = arith.constant 0 : i32
    return %c0_i32, %arg0 : i32, i32
  }
  func.func @transform_3(%arg0: i32, %arg1: i32) -> (i32, i32, i32) {
    %c0_i32 = arith.constant 0 : i32
    %c0_i32_0 = arith.constant 0 : i32
    %c0_i32_1 = arith.constant 0 : i32
    return %arg0, %c0_i32, %c0_i32_0 : i32, i32, i32
  }
  func.func @transform_4(%arg0: i32, %arg1: i32) -> (i32, i32, i32) {
    %c0_i32 = arith.constant 0 : i32
    %c0_i32_0 = arith.constant 0 : i32
    %c0_i32_1 = arith.constant 0 : i32
    return %arg0, %c0_i32, %c0_i32_0 : i32, i32, i32
  }
  func.func @transform_5(%arg0: i32, %arg1: i32) -> (i32, i32, i32) {
    %c0_i32 = arith.constant 0 : i32
    %c0_i32_0 = arith.constant 0 : i32
    %c0_i32_1 = arith.constant 0 : i32
    return %arg0, %c0_i32, %c0_i32_0 : i32, i32, i32
  }
  func.func @transform_6(%arg0: i32, %arg1: i32) -> (i32, i32) {
    %c0_i32 = arith.constant 0 : i32
    return %arg1, %arg0 : i32, i32
  }
  func.func @transform_7(%arg0: i32, %arg1: i32) -> (i32, i32) {
    %c0_i32 = arith.constant 0 : i32
    %c0_i32_0 = arith.constant 0 : i32
    return %c0_i32, %arg0 : i32, i32
  }
  func.func @transform_8(%arg0: i32, %arg1: i32) -> (i32, i32) {
    %c0_i32 = arith.constant 0 : i32
    %c0_i32_0 = arith.constant 0 : i32
    return %c0_i32, %arg0 : i32, i32
  }
}

</mosaic_0001>

<bundles_post_ra>
// kernel: rnn_model_forward.2
= control target key start
LH: loop header
LB: loop body
LE: loop exit
PB: predicated region body
PF: predicated region fallthrough
CT: control target
= control target key end

     0   :  { %vm47_vm0 = vcmask 261120   ;;  %s199_s1 = inlined_call_operand.vmem [shape: bf16[32,128], index: 1, kind: input, shape index: {}]   ;;  %s200_s0 = inlined_call_operand.vmem [shape: f32[64,32], index: 0, kind: input, shape index: {}]   ;;  %s201_s2 = inlined_call_operand.vmem [shape: f32[1,128], index: 2, kind: input, shape index: {}]   ;;  %s202_s3 = inlined_call_operand.vmem [shape: f32[64,128], index: 3, kind: output, shape index: {}]  }
   0x1   :  { %v114_v0 = vld [vmem:[%s199_s1 + $0x8] sm:$0xff]  ;;  %v113_v1 = vld [vmem:[%s199_s1] sm:$0xff]  ;;  %v17_v4 = vld [vmem:[%s200_s0 + $0x10] sm:$0xff] }
   0x2   :  { %v15_v2 = vld [vmem:[%s200_s0] sm:$0xff]  ;;  %v16_v3 = vld [vmem:[%s200_s0 + $0x8] sm:$0xff]  ;;  %66 = vmatpush.bf16.msra.mxu0 %v114_v0  ;;  %115 = vmatpush.bf16.msra.mxu1 %v114_v0  ;;  %v18_v5 = vld [vmem:[%s200_s0 + $0x18] sm:$0xff] }
   0x3   :  { %v19_v6 = vld [vmem:[%s200_s0 + $0x20] sm:$0xff]  ;;  %v20_v7 = vld [vmem:[%s200_s0 + $0x28] sm:$0xff]  ;;  %116 = vmatpush.bf16.msra.mxu2 %v114_v0  ;;  %117 = vmatpush.bf16.msra.mxu3 %v114_v0  ;;  %v21_v8 = vld [vmem:[%s200_s0 + $0x30] sm:$0xff]  ;;  %v23_v10 = vpack.c.bf16 %v16_v3, %v15_v2  ;;  %v24_v11 = vpack.c.bf16 %v18_v5, %v17_v4 }
   0x4   :  { %v22_v9 = vld [vmem:[%s200_s0 + $0x38] sm:$0xff]  ;;  %v25_v12 = vpack.c.bf16 %v20_v7, %v19_v6  ;;  %v121_v14 = vld [vmem:[%s201_s2] ss:$0 sm:$0xff] }
   0x5   :  { %v26_v13 = vpack.c.bf16 %v22_v9, %v21_v8 }
   0x6   :  { %67 = vmatpush.bf16.msra.mxu0 %v113_v1  ;;  %118 = vmatpush.bf16.msra.mxu1 %v113_v1 }
   0x7   :  { %119 = vmatpush.bf16.msra.mxu2 %v113_v1  ;;  %120 = vmatpush.bf16.msra.mxu3 %v113_v1 }
   0x9   :  { %109 = vmatmul.msk.bf16.vlgmr.msra.gmra.mxu0 %vm47_vm0, %v23_v10  ;;  %110 = vmatmul.msk.bf16.vlgmr.msra.gmra.mxu1 %vm47_vm0, %v24_v11 }
   0xa   :  { %111 = vmatmul.msk.bf16.vlgmr.msra.gmra.mxu2 %vm47_vm0, %v25_v12  ;;  %112 = vmatmul.msk.bf16.vlgmr.msra.gmra.mxu3 %vm47_vm0, %v26_v13 }
  0x86   :  { %v69_v15 = vpop.f32.mrf.mxu0  ;;  %v74_v16 = vpop.f32.mrf.mxu1 }
  0x87   :  { %v70_v17 = vadd.f32 %v121_v14, %v69_v15  ;;  %v75_v18 = vadd.f32 %v121_v14, %v74_v16 }
  0x89   :  { %89 = vst [vmem:[%s202_s3] sm:$0xff] %v70_v17 }
  0x8a   :  { %91 = vst [vmem:[%s202_s3 + $0x10] sm:$0xff] %v75_v18 }
  0x8d   :  { %v79_v19 = vpop.f32.mrf.mxu2  ;;  %v84_v20 = vpop.f32.mrf.mxu3 }
  0x8e   :  { %v80_v21 = vadd.f32 %v121_v14, %v79_v19  ;;  %v85_v22 = vadd.f32 %v121_v14, %v84_v20  ;;  %v71_v23 = vpop.f32.mrf.mxu0  ;;  %v76_v24 = vpop.f32.mrf.mxu1 }
  0x8f   :  { %v72_v25 = vadd.f32 %v121_v14, %v71_v23  ;;  %v77_v26 = vadd.f32 %v121_v14, %v76_v24 }
  0x90   :  { %93 = vst [vmem:[%s202_s3 + $0x20] sm:$0xff] %v80_v21 }
  0x91   :  { %95 = vst [vmem:[%s202_s3 + $0x30] sm:$0xff] %v85_v22 }
  0x92   :  { %90 = vst [vmem:[%s202_s3 + $0x8] sm:$0xff] %v72_v25 }
  0x93   :  { %92 = vst [vmem:[%s202_s3 + $0x18] sm:$0xff] %v77_v26 }
  0x95   :  { %v81_v27 = vpop.f32.mrf.mxu2  ;;  %v86_v28 = vpop.f32.mrf.mxu3 }
  0x96   :  { %v82_v29 = vadd.f32 %v121_v14, %v81_v27  ;;  %v87_v30 = vadd.f32 %v121_v14, %v86_v28 }
  0x98   :  { %94 = vst [vmem:[%s202_s3 + $0x28] sm:$0xff] %v82_v29 }
  0x99   :  { %96 = vst [vmem:[%s202_s3 + $0x38] sm:$0xff] %v87_v30 }

// kernel: rnn_model_forward.3
= control target key start
LH: loop header
LB: loop body
LE: loop exit
PB: predicated region body
PF: predicated region fallthrough
CT: control target
= control target key end

     0   :  { %s3872_s0 = inlined_call_operand.vmem [shape: f32[64,128], index: 0, kind: input, shape index: {}]   ;;  %s3873_s1 = inlined_call_operand.vmem [shape: f32[8,256], index: 1, kind: input, shape index: {}]   ;;  %s3874_s2 = inlined_call_operand.vmem [shape: f32[8,256], index: 2, kind: input, shape index: {}]   ;;  %s3875_s3 = inlined_call_operand.hbm [shape: bf16[2,128,512], index: 3, kind: input, shape index: {}]   ;;  %s3876_s4 = inlined_call_operand.vmem [shape: f32[2,1,512], index: 4, kind: input, shape index: {}]   ;;  %s3877_s5 = inlined_call_operand.hbm [shape: bf16[2,128,512], index: 5, kind: input, shape index: {}]   ;;  %s3878_s6 = inlined_call_operand.vmem [shape: f32[64,256], index: 6, kind: output, shape index: {0}]   ;;  %s3879_s7 = inlined_call_operand.vmem [shape: f32[8,256], index: 7, kind: output, shape index: {1}]   ;;  %s3880_s8 = inlined_call_operand.vmem [shape: f32[8,256], index: 8, kind: output, shape index: {2}]  }
   0x1   :  { %3883 = sst [smem:[#allocation34_spill]] %s3875_s3 }
   0x2   :  { %14 = vsyncpa [#allocation4], 0 }
   0x3   :  { %16 = vsyncpa [#allocation4 + $0x1], 0 }
   0x4   :  { %17 = vsyncpa [#allocation6], 0 }
   0x5   :  { %19 = vsyncpa [#allocation6 + $0x1], 0  ;;  %s3088_s27 = smov 0   ;;  %s3090_s28 = smov 0  }
   0x6   :  { %s3092_s29 = smov 0   ;;  %s3094_s30 = smov 0  }
   0x7   :  { %s3096_s9 = smov 0   ;;  %s3098_s10 = smov 0  }
   0x8 LB: > { %3884 = sst [smem:[#allocation10_spill]] %s3035_s9  ;;  %s2358_s11 = sadd.s32 4294967295, %s3039_s10   ;;  %s3039_s10 = sphi %s3098_s10, %s25_s10   ;;  %s3035_s9 = sphi %s3096_s9, %s3936_s9   ;;  %s3031_s30 = sphi %s3094_s30, %s3940_s30   ;;  %s3027_s29 = sphi %s3092_s29, %s3939_s29   ;;  %s3023_s28 = sphi %s3090_s28, %s3938_s28   ;;  %s3019_s27 = sphi %s3088_s27, %s3937_s27  }
   0x9   : > { %s37_s12 = sadd.s32 1, %s3035_s9  ;;  %s122_s13 = sadd.s32 1, %s3027_s29 }
   0xa   : > { %p39_p0 = scmp.ge.s32.totalorder %s37_s12, 2  ;;  %p129_p1 = scmp.ne.s32.totalorder %s3027_s29, %s3023_s28 }
   0xb   : > { %p130_p2 = scmp.eq.s32.totalorder %s3039_s10, 0  ;;  %p135_p4 = scmp.ne.s32.totalorder %s3023_s28, %s3019_s27 }
   0xc   : > { %s3942_s12 = smov (%p39_p0, %s37_s12), 0  ;;  %p136_p5 = scmp.eq.s32.totalorder %s2358_s11, 0 }
   0xd   : > { %3885 = sst [smem:[#allocation11_spill]] %s3942_s12  ;;  %p3124_p3 = por %p130_p2, %p129_p1 }
   0xe   : > { %s119_s15 = ssub.s32 %s3035_s9, %s3942_s12  ;;  %p213_p7 = scmp.eq.s32.totalorder %s2358_s11, 1 }
   0xf   : > { %p120_p6 = scmp.eq.s32.totalorder %s119_s15, 0  ;;  %p3131_p8 = por %p136_p5, %p135_p4 }
  0x10   : > { %p3138_p9 = por %p213_p7, %p129_p1  ;;  %p2746_p10 = scmp.lt.s32.totalorder %s3039_s10, 2 }
  0x11   : > { %s3136_s17 = scalar_select %p120_p6, %s3027_s29, %s122_s13  }
  0x12   : > { %s3144_s19 = sand.u32 1, %s3027_s29   ;;  %s2669_s20 = sshll.u32 %s3035_s9, 8 }
  0x13   : > { %3888 = sst [smem:[#allocation12_spill]] %s3136_s17  ;;  %s2363_s21 = sshll.u32 %s3144_s19, 8 }
  0x14   : > { %s3890_s3 = sld [smem:[#allocation34_spill]]  ;;  %s318_s26 = scalar_lea.vmem [#allocation3], %s2363_s21 }
  0x15   : > { %s326_s27 = sshll.u32 %s318_s26, 4  ;;  %p3153_p11 = pnand %p2746_p10, %p3124_p3  ;;  %s327_s27 = int_to_ptr.vmem [resolvable:$true] %s326_s27 }
  0x16   : > { %p2369_p12 = scmp.ge.s32.totalorder %s3039_s10, 1  ;;  %p363_p13 = scmp.lt.s32.totalorder %s3039_s10, 3 }
  0x17   : > { %s315_s13 = scalar_lea.sflag [#allocation4], %s3144_s19  ;;  %s3041_s15 = smov 256  }
  0x18   : > { %s3042_s12 = smov 16   ;;  %p364_p0 = pnand %p2369_p12, %p363_p13 }
  0x19   : > { %s347_s14 = scalar_lea.vmem [#allocation5], %s2363_s21  ;;  %s344_s9 = scalar_lea.sflag [#allocation6], %s3144_s19 }
  0x1a   : > { %s323_s24 = scalar_lea.hbm %s3890_s3, %s2669_s20  ;;  %s355_s3 = sshll.u32 %s347_s14, 4  ;;  %s356_s3 = int_to_ptr.vmem [resolvable:$true] %s355_s3 }
  0x1b   : > { %s324_s25 = sshll.u32 %s323_s24, 4  ;;  %s352_s24 = scalar_lea.hbm %s3877_s5, %s2669_s20  ;;  %s325_s25 = int_to_ptr.hbm [resolvable:$true] %s324_s25 }
  0x1c   : > { %2742 = dma.hbm_to_vmem [thread:$0]  (!%p3153_p11), %s325_s25, 4096, %s327_s27, %s315_s13, %s3041_s15, %s3041_s15, %s3042_s12  }
  0x1d   : > { %s353_s26 = sshll.u32 %s352_s24, 4  ;;  %367 = sbr.rel (%p364_p0) target bundleno = 1522 (0x5f2), region = 44  ;;  %s354_s26 = int_to_ptr.hbm [resolvable:$true] %s353_s26 }
  0x1e   : > { %2745 = dma.hbm_to_vmem [thread:$0]  (!%p3153_p11), %s354_s26, 4096, %s356_s3, %s344_s9, %s3041_s15, %s3041_s15, %s3042_s12  }
  0x22   : > { %s3169_s17 = sand.u32 1, %s3023_s28  }
  0x23   : > { %s2370_s25 = sshll.u32 %s3169_s17, 8  ;;  %s370_s27 = scalar_lea.sflag [#allocation4], %s3169_s17 }
  0x24   : > { %s3173_s13 = scalar_lea.vmem [#allocation3], %s2370_s25 }
  0x25   : > { %3010 = dma.done.wait (%p3131_p8), %s370_s27, 4096  }
  0x26   : > { %3012 = vsyncadd (%p3131_p8), %s370_s27, 4294963200  ;;  %s380_s19 = scalar_lea.sflag [#allocation6], %s3169_s17  ;;  %s3180_s3 = scalar_lea.vmem [#allocation5], %s2370_s25 }
  0x27   : > { %3014 = dma.done.wait (%p3131_p8), %s380_s19, 4096  }
  0x28   : > { %3016 = vsyncadd (%p3131_p8), %s380_s19, 4294963200  ;;  %v2492_v0 = vld [vmem:[%s3173_s13 + $0xe0] sm:$0xf]  ;;  %v2701_v1 = vld [vmem:[%s3173_s13 + $0xec] sm:$0xf0]  ;;  %p452_p1 = scmp.lt.s32.totalorder %s3031_s30, 1 }
  0x29   : > { %v2699_v2 = vld [vmem:[%s3173_s13 + $0xe4] sm:$0xf]  ;;  %v2493_v3 = vor.u32 %v2701_v1, %v2492_v0  ;;  %v2494_v4 = vld [vmem:[%s3173_s13 + $0xf0] sm:$0xf0]  ;;  %v2500_v5 = vld [vmem:[%s3173_s13 + $0xe8] sm:$0xf] }
  0x2a   : > { %v2702_v6 = vld [vmem:[%s3173_s13 + $0xf4] sm:$0xf0]  ;;  %v2497_v7 = vor.u32 %v2699_v2, %v2494_v4  ;;  %v2700_v9 = vld [vmem:[%s3173_s13 + $0xec] sm:$0xf]  ;;  %v2502_v10 = vld [vmem:[%s3173_s13 + $0xf8] sm:$0xf0] }
  0x2b   : > { %v2501_v8 = vor.u32 %v2702_v6, %v2500_v5  ;;  %v2476_v11 = vld [vmem:[%s3173_s13 + $0xc0] sm:$0xf]  ;;  %727 = vmatpush.bf16.msra.mxu0 %v2493_v3  ;;  %v2505_v12 = vor.u32 %v2700_v9, %v2502_v10  ;;  %v2697_v13 = vld [vmem:[%s3173_s13 + $0xcc] sm:$0xf0]  ;;  %v2695_v14 = vld [vmem:[%s3173_s13 + $0xc4] sm:$0xf] }
  0x2c   : > { %v2478_v15 = vld [vmem:[%s3173_s13 + $0xd0] sm:$0xf0]  ;;  %756 = vmatpush.bf16.msra.mxu1 %v2497_v7  ;;  %v2477_v16 = vor.u32 %v2697_v13, %v2476_v11  ;;  %v2484_v18 = vld [vmem:[%s3173_s13 + $0xc8] sm:$0xf]  ;;  %v2698_v19 = vld [vmem:[%s3173_s13 + $0xd4] sm:$0xf0] }
  0x2d   : > { %785 = vmatpush.bf16.msra.mxu2 %v2501_v8  ;;  %v2481_v17 = vor.u32 %v2695_v14, %v2478_v15  ;;  %v2696_v20 = vld [vmem:[%s3173_s13 + $0xcc] sm:$0xf]  ;;  %814 = vmatpush.bf16.msra.mxu3 %v2505_v12  ;;  %v2485_v21 = vor.u32 %v2698_v19, %v2484_v18  ;;  %v2486_v22 = vld [vmem:[%s3173_s13 + $0xd8] sm:$0xf0]  ;;  %v2460_v23 = vld [vmem:[%s3173_s13 + $0xa0] sm:$0xf] }
  0x2e   : > { %v2693_v24 = vld [vmem:[%s3173_s13 + $0xac] sm:$0xf0]  ;;  %v2489_v25 = vor.u32 %v2696_v20, %v2486_v22  ;;  %v2691_v26 = vld [vmem:[%s3173_s13 + $0xa4] sm:$0xf]  ;;  %v2462_v27 = vld [vmem:[%s3173_s13 + $0xb0] sm:$0xf0] }
  0x2f   : > { %v2468_v28 = vld [vmem:[%s3173_s13 + $0xa8] sm:$0xf]  ;;  %728 = vmatpush.bf16.msra.mxu0 %v2477_v16  ;;  %v2461_v29 = vor.u32 %v2693_v24, %v2460_v23  ;;  %v2694_v30 = vld [vmem:[%s3173_s13 + $0xb4] sm:$0xf0]  ;;  %v2692_v31 = vld [vmem:[%s3173_s13 + $0xac] sm:$0xf]  ;;  %v2465_v33 = vor.u32 %v2691_v26, %v2462_v27 }
  0x30   : > { %v2470_v32 = vld [vmem:[%s3173_s13 + $0xb8] sm:$0xf0]  ;;  %757 = vmatpush.bf16.msra.mxu1 %v2481_v17  ;;  %v2469_v34 = vor.u32 %v2694_v30, %v2468_v28  ;;  %v2444_v35 = vld [vmem:[%s3173_s13 + $0x80] sm:$0xf]  ;;  %v2689_v36 = vld [vmem:[%s3173_s13 + $0x8c] sm:$0xf0] }
  0x31   : > { %786 = vmatpush.bf16.msra.mxu2 %v2485_v21  ;;  %v2687_v37 = vld [vmem:[%s3173_s13 + $0x84] sm:$0xf]  ;;  %815 = vmatpush.bf16.msra.mxu3 %v2489_v25  ;;  %v2473_v38 = vor.u32 %v2692_v31, %v2470_v32  ;;  %v2446_v39 = vld [vmem:[%s3173_s13 + $0x90] sm:$0xf0]  ;;  %v2452_v40 = vld [vmem:[%s3173_s13 + $0x88] sm:$0xf]  ;;  %v2445_v44 = vor.u32 %v2689_v36, %v2444_v35 }
  0x32   : > { %v2690_v41 = vld [vmem:[%s3173_s13 + $0x94] sm:$0xf0]  ;;  %v2688_v42 = vld [vmem:[%s3173_s13 + $0x8c] sm:$0xf]  ;;  %v2454_v43 = vld [vmem:[%s3173_s13 + $0x98] sm:$0xf0]  ;;  %v2449_v45 = vor.u32 %v2687_v37, %v2446_v39 }
  0x33   : > { %729 = vmatpush.bf16.msra.mxu0 %v2461_v29  ;;  %v2453_v46 = vor.u32 %v2690_v41, %v2452_v40  ;;  %v2428_v47 = vld [vmem:[%s3173_s13 + $0x60] sm:$0xf]  ;;  %v2685_v48 = vld [vmem:[%s3173_s13 + $0x6c] sm:$0xf0]  ;;  %v2683_v49 = vld [vmem:[%s3173_s13 + $0x64] sm:$0xf]  ;;  %v2457_v50 = vor.u32 %v2688_v42, %v2454_v43 }
  0x34   : > { %758 = vmatpush.bf16.msra.mxu1 %v2465_v33  ;;  %v2430_v51 = vld [vmem:[%s3173_s13 + $0x70] sm:$0xf0]  ;;  %v2436_v52 = vld [vmem:[%s3173_s13 + $0x68] sm:$0xf]  ;;  %v2686_v53 = vld [vmem:[%s3173_s13 + $0x74] sm:$0xf0]  ;;  %v2429_v56 = vor.u32 %v2685_v48, %v2428_v47 }
  0x35   : > { %787 = vmatpush.bf16.msra.mxu2 %v2469_v34  ;;  %816 = vmatpush.bf16.msra.mxu3 %v2473_v38  ;;  %v2684_v54 = vld [vmem:[%s3173_s13 + $0x6c] sm:$0xf]  ;;  %v2438_v55 = vld [vmem:[%s3173_s13 + $0x78] sm:$0xf0]  ;;  %v2433_v57 = vor.u32 %v2683_v49, %v2430_v51  ;;  %v2437_v58 = vor.u32 %v2686_v53, %v2436_v52  ;;  %v2412_v59 = vld [vmem:[%s3173_s13 + $0x40] sm:$0xf] }
  0x36   : > { %v2681_v60 = vld [vmem:[%s3173_s13 + $0x4c] sm:$0xf0]  ;;  %v2679_v61 = vld [vmem:[%s3173_s13 + $0x44] sm:$0xf]  ;;  %v2441_v62 = vor.u32 %v2684_v54, %v2438_v55  ;;  %v2414_v63 = vld [vmem:[%s3173_s13 + $0x50] sm:$0xf0] }
  0x37   : > { %730 = vmatpush.bf16.msra.mxu0 %v2445_v44  ;;  %v2420_v0 = vld [vmem:[%s3173_s13 + $0x48] sm:$0xf]  ;;  %v2682_v1 = vld [vmem:[%s3173_s13 + $0x54] sm:$0xf0]  ;;  %v2680_v2 = vld [vmem:[%s3173_s13 + $0x4c] sm:$0xf]  ;;  %v2413_v4 = vor.u32 %v2681_v60, %v2412_v59  ;;  %v2417_v5 = vor.u32 %v2679_v61, %v2414_v63 }
  0x38   : > { %759 = vmatpush.bf16.msra.mxu1 %v2449_v45  ;;  %v2422_v3 = vld [vmem:[%s3173_s13 + $0x58] sm:$0xf0]  ;;  %v2421_v6 = vor.u32 %v2682_v1, %v2420_v0  ;;  %v2396_v7 = vld [vmem:[%s3173_s13 + $0x20] sm:$0xf]  ;;  %v2677_v8 = vld [vmem:[%s3173_s13 + $0x2c] sm:$0xf0] }
  0x39   : > { %788 = vmatpush.bf16.msra.mxu2 %v2453_v46  ;;  %817 = vmatpush.bf16.msra.mxu3 %v2457_v50  ;;  %v2675_v9 = vld [vmem:[%s3173_s13 + $0x24] sm:$0xf]  ;;  %v2425_v10 = vor.u32 %v2680_v2, %v2422_v3  ;;  %v2398_v11 = vld [vmem:[%s3173_s13 + $0x30] sm:$0xf0]  ;;  %v2404_v12 = vld [vmem:[%s3173_s13 + $0x28] sm:$0xf]  ;;  %v2397_v16 = vor.u32 %v2677_v8, %v2396_v7 }
  0x3a   : > { %v2678_v13 = vld [vmem:[%s3173_s13 + $0x34] sm:$0xf0]  ;;  %v2676_v14 = vld [vmem:[%s3173_s13 + $0x2c] sm:$0xf]  ;;  %v2406_v15 = vld [vmem:[%s3173_s13 + $0x38] sm:$0xf0]  ;;  %v2401_v19 = vor.u32 %v2675_v9, %v2398_v11 }
  0x3b   : > { %731 = vmatpush.bf16.msra.mxu0 %v2429_v56  ;;  %v2380_v17 = vld [vmem:[%s3173_s13] sm:$0xf]  ;;  %v2673_v18 = vld [vmem:[%s3173_s13 + $0xc] sm:$0xf0]  ;;  %v2405_v20 = vor.u32 %v2678_v13, %v2404_v12  ;;  %v2671_v21 = vld [vmem:[%s3173_s13 + $0x4] sm:$0xf]  ;;  %v2409_v24 = vor.u32 %v2676_v14, %v2406_v15 }
  0x3c   : > { %760 = vmatpush.bf16.msra.mxu1 %v2433_v57  ;;  %v2382_v22 = vld [vmem:[%s3173_s13 + $0x10] sm:$0xf0]  ;;  %v2388_v23 = vld [vmem:[%s3173_s13 + $0x8] sm:$0xf]  ;;  %v2674_v25 = vld [vmem:[%s3173_s13 + $0x14] sm:$0xf0]  ;;  %v2381_v31 = vor.u32 %v2673_v18, %v2380_v17 }
  0x3d   : > { %789 = vmatpush.bf16.msra.mxu2 %v2437_v58  ;;  %818 = vmatpush.bf16.msra.mxu3 %v2441_v62  ;;  %v2672_v26 = vld [vmem:[%s3173_s13 + $0xc] sm:$0xf]  ;;  %v2390_v27 = vld [vmem:[%s3173_s13 + $0x18] sm:$0xf0]  ;;  %v546_v28 = vld [vmem:[%s3872_s0] sm:$0xff]  ;;  %v2385_v35 = vor.u32 %v2671_v21, %v2382_v22  ;;  %v2389_v36 = vor.u32 %v2674_v25, %v2388_v23  ;;  %s2372_s14 = sshll.u32 %s3169_s17, 6 }
  0x3e   : > { %v2620_v29 = vld [vmem:[%s3180_s3 + $0xe0] sm:$0xf]  ;;  %v2733_v30 = vld [vmem:[%s3180_s3 + $0xec] sm:$0xf0]  ;;  %v547_v32 = vld [vmem:[%s3872_s0 + $0x8] sm:$0xff]  ;;  %v2393_v37 = vor.u32 %v2672_v26, %v2390_v27  ;;  %s3609_s25 = scalar_lea.vmem [#allocation7], %s2372_s14 }
  0x3f   : > { %732 = vmatpush.bf16.msra.mxu0 %v2413_v4  ;;  %v2731_v33 = vld [vmem:[%s3180_s3 + $0xe4] sm:$0xf]  ;;  %v2622_v34 = vld [vmem:[%s3180_s3 + $0xf0] sm:$0xf0]  ;;  %v3260_v38 = vor.u32 %v2733_v30, %v2620_v29  ;;  %v2732_v39 = vld [vmem:[%s3180_s3 + $0xec] sm:$0xf]  ;;  %v554_v42 = vpack.c.bf16 %v547_v32, %v546_v28 }
  0x40   : > { %761 = vmatpush.bf16.msra.mxu1 %v2417_v5  ;;  %v2628_v40 = vld [vmem:[%s3180_s3 + $0xe8] sm:$0xf]  ;;  %v2734_v41 = vld [vmem:[%s3180_s3 + $0xf4] sm:$0xf0]  ;;  %v3265_v43 = vor.u32 %v2731_v33, %v2622_v34  ;;  %v2630_v44 = vld [vmem:[%s3180_s3 + $0xf8] sm:$0xf0] }
  0x41   : > { %790 = vmatpush.bf16.msra.mxu2 %v2421_v6  ;;  %819 = vmatpush.bf16.msra.mxu3 %v2425_v10  ;;  %v2604_v45 = vld [vmem:[%s3180_s3 + $0xc0] sm:$0xf]  ;;  %v2729_v46 = vld [vmem:[%s3180_s3 + $0xcc] sm:$0xf0]  ;;  %v2727_v47 = vld [vmem:[%s3180_s3 + $0xc4] sm:$0xf]  ;;  %v3272_v49 = vor.u32 %v2734_v41, %v2628_v40  ;;  %v3275_v50 = vor.u32 %v2732_v39, %v2630_v44 }
  0x42   : > { %v2606_v48 = vld [vmem:[%s3180_s3 + $0xd0] sm:$0xf0]  ;;  %v3277_v51 = vor.u32 %v2729_v46, %v2604_v45  ;;  %v2728_v52 = vld [vmem:[%s3180_s3 + $0xcc] sm:$0xf]  ;;  %v2612_v53 = vld [vmem:[%s3180_s3 + $0xc8] sm:$0xf] }
  0x43   : > { %733 = vmatpush.bf16.msra.mxu0 %v2397_v16  ;;  %v2730_v54 = vld [vmem:[%s3180_s3 + $0xd4] sm:$0xf0]  ;;  %v3283_v55 = vor.u32 %v2727_v47, %v2606_v48  ;;  %v2614_v56 = vld [vmem:[%s3180_s3 + $0xd8] sm:$0xf0]  ;;  %v2588_v57 = vld [vmem:[%s3180_s3 + $0xa0] sm:$0xf] }
  0x44   : > { %762 = vmatpush.bf16.msra.mxu1 %v2401_v19  ;;  %v2725_v58 = vld [vmem:[%s3180_s3 + $0xac] sm:$0xf0]  ;;  %v2723_v59 = vld [vmem:[%s3180_s3 + $0xa4] sm:$0xf]  ;;  %v2590_v60 = vld [vmem:[%s3180_s3 + $0xb0] sm:$0xf0]  ;;  %v3291_v61 = vor.u32 %v2730_v54, %v2612_v53  ;;  %v3295_v62 = vor.u32 %v2728_v52, %v2614_v56 }
  0x45   : > { %791 = vmatpush.bf16.msra.mxu2 %v2405_v20  ;;  %820 = vmatpush.bf16.msra.mxu3 %v2409_v24  ;;  %v3297_v63 = vor.u32 %v2725_v58, %v2588_v57  ;;  %v2724_v0 = vld [vmem:[%s3180_s3 + $0xac] sm:$0xf]  ;;  %v2596_v1 = vld [vmem:[%s3180_s3 + $0xa8] sm:$0xf]  ;;  %v2726_v2 = vld [vmem:[%s3180_s3 + $0xb4] sm:$0xf0]  ;;  %v3303_v3 = vor.u32 %v2723_v59, %v2590_v60 }
  0x46   : > { %v2598_v4 = vld [vmem:[%s3180_s3 + $0xb8] sm:$0xf0]  ;;  %v2572_v5 = vld [vmem:[%s3180_s3 + $0x80] sm:$0xf]  ;;  %v2721_v6 = vld [vmem:[%s3180_s3 + $0x8c] sm:$0xf0]  ;;  %v3311_v9 = vor.u32 %v2726_v2, %v2596_v1 }
  0x47   : > { %734 = vmatpush.bf16.msra.mxu0 %v2381_v31  ;;  %v2719_v7 = vld [vmem:[%s3180_s3 + $0x84] sm:$0xf]  ;;  %v2574_v8 = vld [vmem:[%s3180_s3 + $0x90] sm:$0xf0]  ;;  %v3318_v11 = vor.u32 %v2724_v0, %v2598_v4  ;;  %v3320_v12 = vor.u32 %v2721_v6, %v2572_v5  ;;  %v2720_v13 = vld [vmem:[%s3180_s3 + $0x8c] sm:$0xf] }
  0x48   : > { %763 = vmatpush.bf16.msra.mxu1 %v2385_v35  ;;  %v548_v10 = vld [vmem:[%s3872_s0 + $0x10] sm:$0xff]  ;;  %v2580_v14 = vld [vmem:[%s3180_s3 + $0x88] sm:$0xf]  ;;  %v2722_v15 = vld [vmem:[%s3180_s3 + $0x94] sm:$0xf0]  ;;  %v3326_v16 = vor.u32 %v2719_v7, %v2574_v8  ;;  %s2666_s16 = sshll.u32 (%p3138_p9), %s3031_s30, 3 }
  0x49   : > { %792 = vmatpush.bf16.msra.mxu2 %v2389_v36  ;;  %821 = vmatpush.bf16.msra.mxu3 %v2393_v37  ;;  %v2582_v17 = vld [vmem:[%s3180_s3 + $0x98] sm:$0xf0]  ;;  %v2556_v18 = vld [vmem:[%s3180_s3 + $0x60] sm:$0xf]  ;;  %v2717_v19 = vld [vmem:[%s3180_s3 + $0x6c] sm:$0xf0]  ;;  %v3337_v23 = vor.u32 %v2722_v15, %v2580_v14 }
  0x4a   : > { %735 = vmatmul.bf16.vlgmr.msra.gmra.mxu0 %v554_v42  ;;  %v549_v20 = vld [vmem:[%s3872_s0 + $0x18] sm:$0xff]  ;;  %v2715_v21 = vld [vmem:[%s3180_s3 + $0x64] sm:$0xf]  ;;  %v2558_v22 = vld [vmem:[%s3180_s3 + $0x70] sm:$0xf0]  ;;  %v3341_v24 = vor.u32 %v2720_v13, %v2582_v17  ;;  %v3343_v25 = vor.u32 %v2717_v19, %v2556_v18 }
  0x4b   : > { %1045 = vmatpush.bf16.msrb.mxu0 %v3260_v38  ;;  %764 = vmatmul.bf16.vlgmr.msra.gmra.mxu1 %v554_v42  ;;  %v2716_v26 = vld [vmem:[%s3180_s3 + $0x6c] sm:$0xf]  ;;  %v2564_v27 = vld [vmem:[%s3180_s3 + $0x68] sm:$0xf]  ;;  %v2718_v28 = vld [vmem:[%s3180_s3 + $0x74] sm:$0xf0]  ;;  %v555_v29 = vpack.c.bf16 %v549_v20, %v548_v10  ;;  %v3349_v30 = vor.u32 %v2715_v21, %v2558_v22 }
  0x4c   : > { %1058 = vmatpush.bf16.msrb.mxu1 %v3265_v43  ;;  %793 = vmatmul.bf16.vlgmr.msra.gmra.mxu2 %v554_v42  ;;  %v2566_v31 = vld [vmem:[%s3180_s3 + $0x78] sm:$0xf0]  ;;  %v2540_v32 = vld [vmem:[%s3180_s3 + $0x40] sm:$0xf]  ;;  %v2713_v33 = vld [vmem:[%s3180_s3 + $0x4c] sm:$0xf0]  ;;  %v3357_v36 = vor.u32 %v2718_v28, %v2564_v27 }
  0x4d   : > { %822 = vmatmul.bf16.vlgmr.msra.gmra.mxu3 %v554_v42  ;;  %1071 = vmatpush.bf16.msrb.mxu2 %v3272_v49  ;;  %v2711_v34 = vld [vmem:[%s3180_s3 + $0x44] sm:$0xf]  ;;  %v2542_v35 = vld [vmem:[%s3180_s3 + $0x50] sm:$0xf0]  ;;  %v3361_v37 = vor.u32 %v2716_v26, %v2566_v31  ;;  %v3363_v39 = vor.u32 %v2713_v33, %v2540_v32  ;;  %v2712_v41 = vld [vmem:[%s3180_s3 + $0x4c] sm:$0xf] }
  0x4e   : > { %1084 = vmatpush.bf16.msrb.mxu3 %v3275_v50  ;;  %v3366_v40 = vor.u32 %v2711_v34, %v2542_v35  ;;  %v2550_v42 = vld [vmem:[%s3180_s3 + $0x58] sm:$0xf0]  ;;  %v2524_v44 = vld [vmem:[%s3180_s3 + $0x20] sm:$0xf]  ;;  %v2709_v45 = vld [vmem:[%s3180_s3 + $0x2c] sm:$0xf0] }
  0x4f   : > { %1046 = vmatpush.bf16.msrb.mxu0 %v3277_v51  ;;  %v2707_v46 = vld [vmem:[%s3180_s3 + $0x24] sm:$0xf]  ;;  %v3376_v47 = vor.u32 %v2712_v41, %v2550_v42  ;;  %v3378_v48 = vor.u32 %v2709_v45, %v2524_v44  ;;  %v2526_v52 = vld [vmem:[%s3180_s3 + $0x30] sm:$0xf0]  ;;  %v2548_v53 = vld [vmem:[%s3180_s3 + $0x48] sm:$0xf] }
  0x50   : > { %1059 = vmatpush.bf16.msrb.mxu1 %v3283_v55  ;;  %v2714_v54 = vld [vmem:[%s3180_s3 + $0x54] sm:$0xf0]  ;;  %v3384_v56 = vor.u32 %v2707_v46, %v2526_v52  ;;  %v2708_v58 = vld [vmem:[%s3180_s3 + $0x2c] sm:$0xf]  ;;  %v2534_v59 = vld [vmem:[%s3180_s3 + $0x38] sm:$0xf0] }
  0x51   : > { %1072 = vmatpush.bf16.msrb.mxu2 %v3291_v61  ;;  %v3386_v57 = vor.u32 %v2714_v54, %v2548_v53  ;;  %v2508_v60 = vld [vmem:[%s3180_s3] sm:$0xf]  ;;  %v2705_v0 = vld [vmem:[%s3180_s3 + $0xc] sm:$0xf0]  ;;  %v2703_v1 = vld [vmem:[%s3180_s3 + $0x4] sm:$0xf]  ;;  %v3399_v6 = vor.u32 %v2708_v58, %v2534_v59 }
  0x52   : > { %1085 = vmatpush.bf16.msrb.mxu3 %v3295_v62  ;;  %v2510_v2 = vld [vmem:[%s3180_s3 + $0x10] sm:$0xf0]  ;;  %v2532_v4 = vld [vmem:[%s3180_s3 + $0x28] sm:$0xf]  ;;  %v2710_v5 = vld [vmem:[%s3180_s3 + $0x34] sm:$0xf0]  ;;  %v3401_v7 = vor.u32 %v2705_v0, %v2508_v60 }
  0x53   : > { %1047 = vmatpush.bf16.msrb.mxu0 %v3297_v63  ;;  %v3403_v8 = vor.u32 %v2710_v5, %v2532_v4  ;;  %v2516_v10 = vld [vmem:[%s3180_s3 + $0x8] sm:$0xf]  ;;  %v2706_v13 = vld [vmem:[%s3180_s3 + $0x14] sm:$0xf0]  ;;  %v3408_v14 = vor.u32 %v2703_v1, %v2510_v2  ;;  %v2704_v15 = vld [vmem:[%s3180_s3 + $0xc] sm:$0xf] }
  0x54   : > { %1060 = vmatpush.bf16.msrb.mxu1 %v3303_v3  ;;  %v2518_v17 = vld [vmem:[%s3180_s3 + $0x18] sm:$0xf0]  ;;  %v550_v18 = vld [vmem:[%s3872_s0 + $0x20] sm:$0xff]  ;;  %v551_v19 = vld [vmem:[%s3872_s0 + $0x28] sm:$0xff]  ;;  %v3419_v20 = vor.u32 %v2706_v13, %v2516_v10  ;;  %s3453_s3 = scalar_select %p452_p1, %s3031_s30, 1 }
  0x55   : > { %1073 = vmatpush.bf16.msrb.mxu2 %v3311_v9  ;;  %v3423_v21 = vor.u32 %v2704_v15, %v2518_v17  ;;  %v556_v22 = vpack.c.bf16 %v551_v19, %v550_v18  ;;  %v552_v26 = vld [vmem:[%s3872_s0 + $0x30] sm:$0xff]  ;;  %v553_v27 = vld [vmem:[%s3872_s0 + $0x38] sm:$0xff] }
  0x56   : > { %1086 = vmatpush.bf16.msrb.mxu3 %v3318_v11  ;;  %v557_v28 = vpack.c.bf16 %v553_v27, %v552_v26  ;;  %s3460_s9 = sshll.u32 %s3453_s3, 3  ;;  %s2375_s21 = sshll.u32 %s3453_s3, 2 }
  0x57   : > { %1048 = vmatpush.bf16.msrb.mxu0 %v3320_v12  ;;  %s455_s20 = scalar_lea.vmem %s3873_s1, %s3460_s9  ;;  %s463_s22 = scalar_lea.vmem %s3876_s4, %s2375_s21 }
  0x58   : > { %1061 = vmatpush.bf16.msrb.mxu1 %v3326_v16  ;;  %v545_v34 = vld [vmem:[%s463_s22] sm:$0xf]  ;;  %s459_s26 = scalar_lea.vmem %s3874_s2, %s3460_s9  ;;  %s472_s13 = scalar_lea.vmem %s3880_s8, %s3460_s9 }
  0x59   : > { %1074 = vmatpush.bf16.msrb.mxu2 %v3337_v23  ;;  %v3517_v35 = vperm.slane %v545_v34, 2  ;;  %v3519_v41 = vperm.slane %v545_v34, 3  ;;  %v559_v42 = vperm.slane %v545_v34, 0  ;;  %v560_v45 = vperm.slane %v545_v34, 1  ;;  %s468_s12 = scalar_lea.vmem %s3879_s7, %s3460_s9  ;;  %s2089_s21 = scalar_lea.vmem (%p3138_p9), %s3878_s6, %s2666_s16 }
  0x5a   : > { %1087 = vmatpush.bf16.msrb.mxu3 %v3341_v24  ;;  %740 = vmatmul.bf16.gmra.mxu0 %v555_v29 }
  0x5b   : > { %1049 = vmatpush.bf16.msrb.mxu0 %v3343_v25  ;;  %769 = vmatmul.bf16.gmra.mxu1 %v555_v29 }
  0x5c   : > { %1062 = vmatpush.bf16.msrb.mxu1 %v3349_v30  ;;  %798 = vmatmul.bf16.gmra.mxu2 %v555_v29 }
  0x5d   : > { %827 = vmatmul.bf16.gmra.mxu3 %v555_v29  ;;  %1075 = vmatpush.bf16.msrb.mxu2 %v3357_v36  ;;  %v477_v29 = vld [vmem:[%s455_s20] sm:$0xff] }
  0x5e   : > { %1088 = vmatpush.bf16.msrb.mxu3 %v3361_v37  ;;  %v884_v31 = vpack.c.bf16 %v477_v29, %v477_v29 }
  0x5f   : > { %1050 = vmatpush.bf16.msrb.mxu0 %v3363_v39 }
  0x60   : > { %1063 = vmatpush.bf16.msrb.mxu1 %v3366_v40 }
  0x61   : > { %1076 = vmatpush.bf16.msrb.mxu2 %v3386_v57 }
  0x62   : > { %1089 = vmatpush.bf16.msrb.mxu3 %v3376_v47 }
  0x63   : > { %1051 = vmatpush.bf16.msrb.mxu0 %v3378_v48 }
  0x64   : > { %1064 = vmatpush.bf16.msrb.mxu1 %v3384_v56 }
  0x65   : > { %1077 = vmatpush.bf16.msrb.mxu2 %v3403_v8 }
  0x66   : > { %1090 = vmatpush.bf16.msrb.mxu3 %v3399_v6 }
  0x67   : > { %1052 = vmatpush.bf16.msrb.mxu0 %v3401_v7 }
  0x68   : > { %1065 = vmatpush.bf16.msrb.mxu1 %v3408_v14 }
  0x69   : > { %1078 = vmatpush.bf16.msrb.mxu2 %v3419_v20 }
  0x6a   : > { %1091 = vmatpush.bf16.msrb.mxu3 %v3423_v21  ;;  %745 = vmatmul.bf16.gmra.mxu0 %v556_v22 }
  0x6b   : > { %1173 = vmatpush.bf16.msra.mxu0 %v3260_v38  ;;  %774 = vmatmul.bf16.gmra.mxu1 %v556_v22 }
  0x6c   : > { %1186 = vmatpush.bf16.msra.mxu1 %v3265_v43  ;;  %803 = vmatmul.bf16.gmra.mxu2 %v556_v22 }
  0x6d   : > { %1199 = vmatpush.bf16.msra.mxu2 %v3272_v49  ;;  %832 = vmatmul.bf16.gmra.mxu3 %v556_v22 }
  0x6e   : > { %1212 = vmatpush.bf16.msra.mxu3 %v3275_v50 }
  0x6f   : > { %1174 = vmatpush.bf16.msra.mxu0 %v3277_v51 }
  0x70   : > { %1187 = vmatpush.bf16.msra.mxu1 %v3283_v55 }
  0x71   : > { %1200 = vmatpush.bf16.msra.mxu2 %v3291_v61 }
  0x72   : > { %1213 = vmatpush.bf16.msra.mxu3 %v3295_v62 }
  0x73   : > { %1175 = vmatpush.bf16.msra.mxu0 %v3297_v63 }
  0x74   : > { %1188 = vmatpush.bf16.msra.mxu1 %v3303_v3 }
  0x75   : > { %1201 = vmatpush.bf16.msra.mxu2 %v3311_v9 }
  0x76   : > { %1214 = vmatpush.bf16.msra.mxu3 %v3318_v11 }
  0x77   : > { %1176 = vmatpush.bf16.msra.mxu0 %v3320_v12 }
  0x78   : > { %1189 = vmatpush.bf16.msra.mxu1 %v3326_v16 }
  0x79   : > { %1202 = vmatpush.bf16.msra.mxu2 %v3337_v23 }
  0x7a   : > { %1215 = vmatpush.bf16.msra.mxu3 %v3341_v24  ;;  %750 = vmatmul.bf16.gmra.mxu0 %v557_v28 }
  0x7b   : > { %1177 = vmatpush.bf16.msra.mxu0 %v3343_v25  ;;  %779 = vmatmul.bf16.gmra.mxu1 %v557_v28 }
  0x7c   : > { %1190 = vmatpush.bf16.msra.mxu1 %v3349_v30  ;;  %808 = vmatmul.bf16.gmra.mxu2 %v557_v28 }
  0x7d   : > { %1203 = vmatpush.bf16.msra.mxu2 %v3357_v36  ;;  %837 = vmatmul.bf16.gmra.mxu3 %v557_v28 }
  0x7e   : > { %1216 = vmatpush.bf16.msra.mxu3 %v3361_v37 }
  0x7f   : > { %1178 = vmatpush.bf16.msra.mxu0 %v3363_v39 }
  0x80   : > { %1191 = vmatpush.bf16.msra.mxu1 %v3366_v40 }
  0x81   : > { %1204 = vmatpush.bf16.msra.mxu2 %v3386_v57 }
  0x82   : > { %1217 = vmatpush.bf16.msra.mxu3 %v3376_v47 }
  0x83   : > { %1179 = vmatpush.bf16.msra.mxu0 %v3378_v48 }
  0x84   : > { %1192 = vmatpush.bf16.msra.mxu1 %v3384_v56 }
  0x85   : > { %1205 = vmatpush.bf16.msra.mxu2 %v3403_v8 }
  0x86   : > { %1218 = vmatpush.bf16.msra.mxu3 %v3399_v6 }
  0x87   : > { %1180 = vmatpush.bf16.msra.mxu0 %v3401_v7 }
  0x88   : > { %1193 = vmatpush.bf16.msra.mxu1 %v3408_v14 }
  0x89   : > { %1206 = vmatpush.bf16.msra.mxu2 %v3419_v20 }
  0x8a   : > { %1219 = vmatpush.bf16.msra.mxu3 %v3423_v21  ;;  %1053 = vmatmul.bf16.vlgmr.msrb.gmra.mxu0 %v884_v31 }
  0x8b   : > { %1066 = vmatmul.bf16.vlgmr.msrb.gmra.mxu1 %v884_v31  ;;  %1302 = vmatpush.bf16.msrb.mxu0 %v3260_v38 }
  0x8c   : > { %1079 = vmatmul.bf16.vlgmr.msrb.gmra.mxu2 %v884_v31  ;;  %1315 = vmatpush.bf16.msrb.mxu1 %v3265_v43 }
  0x8d   : > { %1092 = vmatmul.bf16.vlgmr.msrb.gmra.mxu3 %v884_v31  ;;  %1328 = vmatpush.bf16.msrb.mxu2 %v3272_v49 }
  0x8e   : > { %1341 = vmatpush.bf16.msrb.mxu3 %v3275_v50 }
  0x8f   : > { %1303 = vmatpush.bf16.msrb.mxu0 %v3277_v51 }
  0x90   : > { %1316 = vmatpush.bf16.msrb.mxu1 %v3283_v55 }
  0x91   : > { %1329 = vmatpush.bf16.msrb.mxu2 %v3291_v61 }
  0x92   : > { %1342 = vmatpush.bf16.msrb.mxu3 %v3295_v62 }
  0x93   : > { %1304 = vmatpush.bf16.msrb.mxu0 %v3297_v63 }
  0x94   : > { %1317 = vmatpush.bf16.msrb.mxu1 %v3303_v3 }
  0x95   : > { %1330 = vmatpush.bf16.msrb.mxu2 %v3311_v9 }
  0x96   : > { %1343 = vmatpush.bf16.msrb.mxu3 %v3318_v11 }
  0x97   : > { %1305 = vmatpush.bf16.msrb.mxu0 %v3320_v12 }
  0x98   : > { %1318 = vmatpush.bf16.msrb.mxu1 %v3326_v16 }
  0x99   : > { %1331 = vmatpush.bf16.msrb.mxu2 %v3337_v23 }
  0x9a   : > { %1344 = vmatpush.bf16.msrb.mxu3 %v3341_v24 }
  0x9b   : > { %1306 = vmatpush.bf16.msrb.mxu0 %v3343_v25 }
  0x9c   : > { %1319 = vmatpush.bf16.msrb.mxu1 %v3349_v30 }
  0x9d   : > { %1332 = vmatpush.bf16.msrb.mxu2 %v3357_v36 }
  0x9e   : > { %1345 = vmatpush.bf16.msrb.mxu3 %v3361_v37 }
  0x9f   : > { %1307 = vmatpush.bf16.msrb.mxu0 %v3363_v39 }
  0xa0   : > { %1320 = vmatpush.bf16.msrb.mxu1 %v3366_v40 }
  0xa1   : > { %1333 = vmatpush.bf16.msrb.mxu2 %v3386_v57 }
  0xa2   : > { %1346 = vmatpush.bf16.msrb.mxu3 %v3376_v47 }
  0xa3   : > { %1308 = vmatpush.bf16.msrb.mxu0 %v3378_v48 }
  0xa4   : > { %1321 = vmatpush.bf16.msrb.mxu1 %v3384_v56 }
  0xa5   : > { %1334 = vmatpush.bf16.msrb.mxu2 %v3403_v8 }
  0xa6   : > { %1347 = vmatpush.bf16.msrb.mxu3 %v3399_v6 }
  0xa7   : > { %1309 = vmatpush.bf16.msrb.mxu0 %v3401_v7 }
  0xa8   : > { %1322 = vmatpush.bf16.msrb.mxu1 %v3408_v14 }
  0xa9   : > { %1335 = vmatpush.bf16.msrb.mxu2 %v3419_v20 }
  0xaa   : > { %1348 = vmatpush.bf16.msrb.mxu3 %v3423_v21 }
  0xc7   : > { %v3513_v32 = vpop.f32.mrf.mxu0 }
  0xc8   : > { %v3515_v33 = vpop.f32.mrf.mxu1 }
  0xcf   : > { %v794_v44 = vpop.f32.mrf.mxu2  ;;  %v738_v53 = vpop.f32.mrf.mxu0 }
  0xd0   : > { %v3522_v46 = vadd.f32 %v794_v44, %v3517_v35  ;;  %v823_v52 = vpop.f32.mrf.mxu3  ;;  %v3527_v58 = vadd.f32 %v738_v53, %v559_v42  ;;  %v767_v59 = vpop.f32.mrf.mxu1 }
  0xd1   : > { %v3525_v54 = vadd.f32 %v823_v52, %v3519_v41  ;;  %v3529_v60 = vadd.f32 %v767_v59, %v560_v45 }
  0xd7   : > { %v796_v0 = vpop.f32.mrf.mxu2  ;;  %v741_v4 = vpop.f32.mrf.mxu0 }
  0xd8   : > { %v3532_v1 = vadd.f32 %v796_v0, %v3517_v35  ;;  %v825_v2 = vpop.f32.mrf.mxu3  ;;  %v3537_v10 = vadd.f32 %v741_v4, %v559_v42  ;;  %v770_v13 = vpop.f32.mrf.mxu1 }
  0xd9   : > { %v3535_v5 = vadd.f32 %v825_v2, %v3519_v41  ;;  %v3539_v15 = vadd.f32 %v770_v13, %v560_v45 }
  0xdf   : > { %v799_v17 = vpop.f32.mrf.mxu2  ;;  %v743_v22 = vpop.f32.mrf.mxu0 }
  0xe0   : > { %v3542_v18 = vadd.f32 %v799_v17, %v3517_v35  ;;  %v828_v19 = vpop.f32.mrf.mxu3  ;;  %v3547_v27 = vadd.f32 %v743_v22, %v559_v42  ;;  %v772_v28 = vpop.f32.mrf.mxu1 }
  0xe1   : > { %v3545_v26 = vadd.f32 %v828_v19, %v3519_v41  ;;  %v3549_v29 = vadd.f32 %v772_v28, %v560_v45 }
  0xe2   : > { %3892 = vst [vmem:[#allocation13_spill] sm:$0xff] %v3542_v18 }
  0xe3   : > { %3893 = vst [vmem:[#allocation14_spill] sm:$0xff] %v3547_v27 }
  0xe4   : > { %3894 = vst [vmem:[#allocation15_spill] sm:$0xff] %v3549_v29 }
  0xe7   : > { %v801_v31 = vpop.f32.mrf.mxu2  ;;  %v746_v52 = vpop.f32.mrf.mxu0 }
  0xe8   : > { %v3552_v34 = vadd.f32 %v801_v31, %v3517_v35  ;;  %v830_v44 = vpop.f32.mrf.mxu3  ;;  %v3557_v59 = vadd.f32 %v746_v52, %v559_v42  ;;  %v775_v0 = vpop.f32.mrf.mxu1 }
  0xe9   : > { %v3555_v53 = vadd.f32 %v830_v44, %v3519_v41  ;;  %v3559_v2 = vadd.f32 %v775_v0, %v560_v45 }
  0xea   : > { %3895 = vst [vmem:[#allocation16_spill] sm:$0xff] %v3552_v34 }
  0xeb   : > { %3896 = vst [vmem:[#allocation17_spill] sm:$0xff] %v3555_v53 }
  0xec   : > { %3897 = vst [vmem:[#allocation18_spill] sm:$0xff] %v3557_v59 }
  0xed   : > { %3898 = vst [vmem:[#allocation19_spill] sm:$0xff] %v3559_v2 }
  0xef   : > { %v804_v4 = vpop.f32.mrf.mxu2  ;;  %v748_v19 = vpop.f32.mrf.mxu0 }
  0xf0   : > { %v3562_v13 = vadd.f32 %v804_v4, %v3517_v35  ;;  %v833_v17 = vpop.f32.mrf.mxu3  ;;  %v3567_v28 = vadd.f32 %v748_v19, %v559_v42  ;;  %v777_v31 = vpop.f32.mrf.mxu1 }
  0xf1   : > { %v3565_v22 = vadd.f32 %v833_v17, %v3519_v41  ;;  %v3569_v34 = vadd.f32 %v777_v31, %v560_v45 }
  0xf2   : > { %3899 = vst [vmem:[#allocation20_spill] sm:$0xff] %v3562_v13 }
  0xf3   : > { %3900 = vst [vmem:[#allocation21_spill] sm:$0xff] %v3565_v22 }
  0xf4   : > { %3901 = vst [vmem:[#allocation22_spill] sm:$0xff] %v3567_v28 }
  0xf5   : > { %3902 = vst [vmem:[#allocation23_spill] sm:$0xff] %v3569_v34 }
  0xf7   : > { %v806_v44 = vpop.f32.mrf.mxu2  ;;  %v751_v2 = vpop.f32.mrf.mxu0 }
  0xf8   : > { %v3572_v52 = vadd.f32 %v806_v44, %v3517_v35  ;;  %v835_v0 = vpop.f32.mrf.mxu3  ;;  %v3577_v4 = vadd.f32 %v751_v2, %v559_v42  ;;  %v780_v13 = vpop.f32.mrf.mxu1  ;;  %v737_v2 = vadd.f32 %v3513_v32, %v559_v42 }
  0xf9   : > { %v3575_v59 = vadd.f32 %v835_v0, %v3519_v41  ;;  %v3579_v53 = vadd.f32 %v780_v13, %v560_v45  ;;  %v766_v13 = vadd.f32 %v3515_v33, %v560_v45 }
  0xfa   : > { %3903 = vst [vmem:[#allocation24_spill] sm:$0xff] %v3572_v52 }
  0xfb   : > { %3904 = vst [vmem:[#allocation25_spill] sm:$0xff] %v3575_v59 }
  0xfc   : > { %3905 = vst [vmem:[#allocation26_spill] sm:$0xff] %v3577_v4 }
  0xfd   : > { %3906 = vst [vmem:[#allocation27_spill] sm:$0xff] %v3579_v53 }
  0xff   : > { %v809_v17 = vpop.f32.mrf.mxu2  ;;  %v753_v34 = vpop.f32.mrf.mxu0 }
 0x100   : > { %v3582_v19 = vadd.f32 %v809_v17, %v3517_v35  ;;  %v838_v31 = vpop.f32.mrf.mxu3  ;;  %v3587_v44 = vadd.f32 %v753_v34, %v559_v42  ;;  %v782_v52 = vpop.f32.mrf.mxu1 }
 0x101   : > { %v3585_v28 = vadd.f32 %v838_v31, %v3519_v41  ;;  %v3589_v22 = vadd.f32 %v782_v52, %v560_v45 }
 0x102   : > { %3907 = vst [vmem:[#allocation28_spill] sm:$0xff] %v3582_v19 }
 0x103   : > { %3908 = vst [vmem:[#allocation29_spill] sm:$0xff] %v3585_v28 }
 0x104   : > { %3909 = vst [vmem:[#allocation30_spill] sm:$0xff] %v3587_v44 }
 0x105   : > { %3910 = vst [vmem:[#allocation31_spill] sm:$0xff] %v3589_v22 }
 0x107   : > { %v811_v0 = vpop.f32.mrf.mxu2  ;;  %v1054_v19 = vpop.f32.mrf.mxu0 }
 0x108   : > { %v3594_v53 = vadd.f32 %v811_v0, %v3517_v35  ;;  %v840_v17 = vpop.f32.mrf.mxu3  ;;  %v1097_v31 = vadd.f32 %v1054_v19, %v737_v2  ;;  %v1067_v28 = vpop.f32.mrf.mxu1 }
 0x109   : > { %v3597_v4 = vadd.f32 %v840_v17, %v3519_v41  ;;  %v1098_v34 = vadd.f32 %v1067_v28, %v766_v13 }
 0x10a   : > { %3911 = vst [vmem:[#allocation32_spill] sm:$0xff] %v3594_v53  ;;  %v2634_v44 = vmul.f32 -1.442695, %v1097_v31 }
 0x10b   : > { %3912 = vst [vmem:[#allocation33_spill] sm:$0xff] %v3597_v4  ;;  %v2635_v59 = vmul.f32 -1.442695, %v1098_v34 }
 0x10c   : > { %2797 = vpow2.f32 %v2634_v44 }
 0x10d   : > { %2799 = vpow2.f32 %v2635_v59 }
 0x10f   : > { %v1080_v52 = vpop.f32.mrf.mxu2  ;;  %v1056_v42 = vpop.f32.mrf.mxu0 }
 0x110   : > { %v1093_v32 = vpop.f32.mrf.mxu3  ;;  %v1069_v45 = vpop.f32.mrf.mxu1  ;;  %v1099_v59 = vadd.f32 %v1080_v52, %v3522_v46 }
 0x111   : > { %v1100_v33 = vadd.f32 %v1093_v32, %v3525_v54 }
 0x112   : > { %v2798_v35 = vpop.eup %2797 }
 0x113   : > { %v2636_v0 = vmul.f32 -1.442695, %v1100_v33  ;;  %v2800_v53 = vpop.eup %2799  ;;  %v1104_v22 = vadd.f32 1.0, %v2798_v35 }
 0x114   : > { %v1123_v29 = vadd.f32 1.0, %v2800_v53 }
 0x115   : > { %2801 = vpow2.f32 %v2636_v0  ;;  %v1116_v32 = vand.u32 2147483648, %v1104_v22  ;;  %v1114_v33 = vand.u32 2147483647, %v1104_v22  ;;  %vm1110_vm2 = vweird.f32 %v1104_v22 }
 0x116   : > { %2803 = vrcp.f32 %v1104_v22  ;;  %v1135_v53 = vand.u32 2147483648, %v1123_v29  ;;  %v1133_v46 = vand.u32 2147483647, %v1123_v29  ;;  %vm1129_vm3 = vweird.f32 %v1123_v29 }
 0x117   : > { %2805 = vrcp.f32 %v1123_v29  ;;  %v1082_v41 = vpop.f32.mrf.mxu2  ;;  %v1117_v0 = vor.u32 1.1754944e-38, %v1116_v32  ;;  %vm1115_vm6 = vcmp.eq.f32.partialorder %v1114_v33, 8.507059e+37 }
 0x118   : > { %v1095_v28 = vpop.f32.mrf.mxu3  ;;  %vm1134_vm7 = vcmp.eq.f32.partialorder %v1133_v46, 8.507059e+37 }
 0x119   : > { %v1136_v28 = vor.u32 1.1754944e-38, %v1135_v53 }
 0x11b   : > { %v2802_v19 = vpop.eup %2801 }
 0x11c   : > { %v2804_v44 = vpop.eup %2803  ;;  %v1143_v2 = vadd.f32 1.0, %v2802_v19  ;;  %v479_v19 = vld [vmem:[%s459_s26] sm:$0xff] }
 0x11d   : > { %v2806_v13 = vpop.eup %2805  ;;  %v1106_v17 = vmul.f32 %v2804_v44, %v1104_v22  ;;  %vm1111_vm0 = vweird.f32 %v2804_v44 }
 0x11e   : > { %v1125_v54 = vmul.f32 %v2806_v13, %v1123_v29  ;;  %2807 = vrcp.f32 %v1143_v2  ;;  %vm1130_vm1 = vweird.f32 %v2806_v13  ;;  %vm1112_vm4 = vmor %vm1110_vm2, %vm1111_vm0  ;;  %v1155_v53 = vand.u32 2147483648, %v1143_v2 }
 0x11f   : > { %v1107_v31 = vsub.f32 1.0, %v1106_v17  ;;  %2809 = vtanh.f32 %v1099_v59  ;;  %vm1131_vm5 = vmor %vm1129_vm3, %vm1130_vm1  ;;  %vm1149_vm9 = vweird.f32 %v1143_v2 }
 0x120   : > { %v1126_v34 = vsub.f32 1.0, %v1125_v54 }
 0x121   : > { %v1108_v42 = vmul.f32 %v2804_v44, %v1107_v31 }
 0x122   : > { %v1127_v45 = vmul.f32 %v2806_v13, %v1126_v34 }
 0x123   : > { %v1109_v52 = vadd.f32 %v2804_v44, %v1108_v42 }
 0x124   : > { %v2808_v35 = vpop.eup %2807  ;;  %v1128_v41 = vadd.f32 %v2806_v13, %v1127_v45  ;;  %v1156_v45 = vor.u32 1.1754944e-38, %v1155_v53 }
 0x125   : > { %v1113_v59 = vsel %vm1112_vm4, %v2804_v44, %v1109_v52  ;;  %v1145_v17 = vmul.f32 %v2808_v35, %v1143_v2  ;;  %v2810_v54 = vpop.eup %2809  ;;  %vm1150_vm8 = vweird.f32 %v2808_v35  ;;  %v1153_v44 = vand.u32 2147483647, %v1143_v2 }
 0x126   : > { %v1118_v31 = vsel %vm1115_vm6, %v1117_v0, %v1113_v59  ;;  %v1132_v4 = vsel %vm1131_vm5, %v2806_v13, %v1128_v41  ;;  %vm1151_vm10 = vmor %vm1149_vm9, %vm1150_vm8 }
 0x127   : > { %v1137_v34 = vsel %vm1134_vm7, %v1136_v28, %v1132_v4  ;;  %v1160_v27 = vmul.f32 %v2810_v54, %v1118_v31  ;;  %v1146_v42 = vsub.f32 1.0, %v1145_v17  ;;  %vm1154_vm11 = vcmp.eq.f32.partialorder %v1153_v44, 8.507059e+37 }
 0x128   : > { %v1159_v22 = vmul.f32 %v1137_v34, %v479_v19 }
 0x129   : > { %v1147_v18 = vmul.f32 %v2808_v35, %v1146_v42 }
 0x12a   : > { %v3605_v29 = vadd.f32 %v1160_v27, %v1159_v22 }
 0x12b   : > { %v1148_v32 = vadd.f32 %v2808_v35, %v1147_v18 }
 0x12c   : > { %2811 = vtanh.f32 %v3605_v29 }
 0x12d   : > { %v1152_v33 = vsel %vm1151_vm10, %v2808_v35, %v1148_v32 }
 0x12e   : > { %v1157_v4 = vsel %vm1154_vm11, %v1156_v45, %v1152_v33 }
 0x132   : > { %v2812_v13 = vpop.eup %2811 }
 0x133   : > { %v1163_v46 = vmul.f32 %v2812_v13, %v1157_v4 }
 0x135   : > { %1164 = vst [vmem:[%s3609_s25] sm:$0xff] %v1163_v46  ;;  %v1172_v27 = vpack.c.bf16 %v1163_v46, %v1163_v46 }
 0x137   : > { %1181 = vmatmul.bf16.vlgmr.msra.gmra.mxu0 %v1172_v27  ;;  %1194 = vmatmul.bf16.vlgmr.msra.gmra.mxu1 %v1172_v27 }
 0x138   : > { %1207 = vmatmul.bf16.vlgmr.msra.gmra.mxu2 %v1172_v27  ;;  %1220 = vmatmul.bf16.vlgmr.msra.gmra.mxu3 %v1172_v27 }
 0x139   : > { %1431 = vmatpush.bf16.msra.mxu0 %v3260_v38  ;;  %1444 = vmatpush.bf16.msra.mxu1 %v3265_v43 }
 0x13a   : > { %1457 = vmatpush.bf16.msra.mxu2 %v3272_v49  ;;  %1470 = vmatpush.bf16.msra.mxu3 %v3275_v50 }
 0x13d   : > { %1432 = vmatpush.bf16.msra.mxu0 %v3277_v51  ;;  %1445 = vmatpush.bf16.msra.mxu1 %v3283_v55 }
 0x13e   : > { %1458 = vmatpush.bf16.msra.mxu2 %v3291_v61  ;;  %1471 = vmatpush.bf16.msra.mxu3 %v3295_v62 }
 0x141   : > { %1433 = vmatpush.bf16.msra.mxu0 %v3297_v63  ;;  %1446 = vmatpush.bf16.msra.mxu1 %v3303_v3 }
 0x142   : > { %1459 = vmatpush.bf16.msra.mxu2 %v3311_v9  ;;  %1472 = vmatpush.bf16.msra.mxu3 %v3318_v11 }
 0x145   : > { %1434 = vmatpush.bf16.msra.mxu0 %v3320_v12  ;;  %1447 = vmatpush.bf16.msra.mxu1 %v3326_v16 }
 0x146   : > { %1460 = vmatpush.bf16.msra.mxu2 %v3337_v23  ;;  %1473 = vmatpush.bf16.msra.mxu3 %v3341_v24 }
 0x149   : > { %1435 = vmatpush.bf16.msra.mxu0 %v3343_v25  ;;  %1448 = vmatpush.bf16.msra.mxu1 %v3349_v30 }
 0x14a   : > { %1461 = vmatpush.bf16.msra.mxu2 %v3357_v36  ;;  %1474 = vmatpush.bf16.msra.mxu3 %v3361_v37 }
 0x14d   : > { %1436 = vmatpush.bf16.msra.mxu0 %v3363_v39  ;;  %1449 = vmatpush.bf16.msra.mxu1 %v3366_v40 }
 0x14e   : > { %1462 = vmatpush.bf16.msra.mxu2 %v3386_v57  ;;  %1475 = vmatpush.bf16.msra.mxu3 %v3376_v47 }
 0x151   : > { %1437 = vmatpush.bf16.msra.mxu0 %v3378_v48  ;;  %1450 = vmatpush.bf16.msra.mxu1 %v3384_v56 }
 0x152   : > { %1463 = vmatpush.bf16.msra.mxu2 %v3403_v8  ;;  %1476 = vmatpush.bf16.msra.mxu3 %v3399_v6 }
 0x155   : > { %1438 = vmatpush.bf16.msra.mxu0 %v3401_v7  ;;  %1451 = vmatpush.bf16.msra.mxu1 %v3408_v14 }
 0x156   : > { %1464 = vmatpush.bf16.msra.mxu2 %v3419_v20  ;;  %1477 = vmatpush.bf16.msra.mxu3 %v3423_v21 }
 0x1b4   : > { %v1182_v18 = vpop.f32.mrf.mxu0  ;;  %v1195_v2 = vpop.f32.mrf.mxu1 }
 0x1b5   : > { %v1225_v52 = vadd.f32 %v1182_v18, %v3527_v58  ;;  %v1226_v35 = vadd.f32 %v1195_v2, %v3529_v60 }
 0x1b7   : > { %v2637_v0 = vmul.f32 -1.442695, %v1225_v52  ;;  %v2638_v41 = vmul.f32 -1.442695, %v1226_v35 }
 0x1b9   : > { %2813 = vpow2.f32 %v2637_v0 }
 0x1ba   : > { %2815 = vpow2.f32 %v2638_v41 }
 0x1bb   : > { %v1208_v28 = vpop.f32.mrf.mxu2  ;;  %v1221_v19 = vpop.f32.mrf.mxu3 }
 0x1bc   : > { %v1228_v59 = vadd.f32 %v1221_v19, %v3535_v5  ;;  %v1184_v17 = vpop.f32.mrf.mxu0  ;;  %v1197_v54 = vpop.f32.mrf.mxu1  ;;  %v1227_v45 = vadd.f32 %v1208_v28, %v3532_v1 }
 0x1be   : > { %v2639_v31 = vmul.f32 -1.442695, %v1228_v59 }
 0x1bf   : > { %v2814_v34 = vpop.eup %2813 }
 0x1c0   : > { %v2816_v42 = vpop.eup %2815  ;;  %v1232_v22 = vadd.f32 1.0, %v2814_v34  ;;  %2817 = vpow2.f32 %v2639_v31 }
 0x1c1   : > { %v1251_v32 = vadd.f32 1.0, %v2816_v42 }
 0x1c2   : > { %2819 = vrcp.f32 %v1232_v22  ;;  %v1244_v18 = vand.u32 2147483648, %v1232_v22  ;;  %v1242_v35 = vand.u32 2147483647, %v1232_v22  ;;  %vm1238_vm14 = vweird.f32 %v1232_v22 }
 0x1c3   : > { %2821 = vrcp.f32 %v1251_v32  ;;  %v1210_v58 = vpop.f32.mrf.mxu2  ;;  %v1223_v60 = vpop.f32.mrf.mxu3  ;;  %v1263_v2 = vand.u32 2147483648, %v1251_v32  ;;  %v1261_v41 = vand.u32 2147483647, %v1251_v32  ;;  %vm1257_vm15 = vweird.f32 %v1251_v32 }
 0x1c4   : > { %v1245_v1 = vor.u32 1.1754944e-38, %v1244_v18  ;;  %vm1243_vm2 = vcmp.eq.f32.partialorder %v1242_v35, 8.507059e+37 }
 0x1c5   : > { %v1264_v54 = vor.u32 1.1754944e-38, %v1263_v2  ;;  %vm1262_vm3 = vcmp.eq.f32.partialorder %v1261_v41, 8.507059e+37 }
 0x1c6   : > { %v2818_v53 = vpop.eup %2817 }
 0x1c7   : > { %v1271_v44 = vadd.f32 1.0, %v2818_v53 }
 0x1c8   : > { %v2820_v33 = vpop.eup %2819 }
 0x1c9   : > { %v2822_v13 = vpop.eup %2821  ;;  %v1234_v4 = vmul.f32 %v2820_v33, %v1232_v22  ;;  %2823 = vrcp.f32 %v1271_v44  ;;  %vm1239_vm12 = vweird.f32 %v2820_v33  ;;  %vm1277_vm5 = vweird.f32 %v1271_v44 }
 0x1ca   : > { %v1253_v5 = vmul.f32 %v2822_v13, %v1251_v32  ;;  %2825 = vtanh.f32 %v1227_v45  ;;  %vm1258_vm13 = vweird.f32 %v2822_v13  ;;  %vm1240_vm0 = vmor %vm1238_vm14, %vm1239_vm12 }
 0x1cb   : > { %v1235_v46 = vsub.f32 1.0, %v1234_v4  ;;  %vm1259_vm1 = vmor %vm1257_vm15, %vm1258_vm13 }
 0x1cc   : > { %v1254_v27 = vsub.f32 1.0, %v1253_v5 }
 0x1cd   : > { %v1236_v52 = vmul.f32 %v2820_v33, %v1235_v46  ;;  %v1283_v46 = vand.u32 2147483648, %v1271_v44 }
 0x1ce   : > { %v1255_v0 = vmul.f32 %v2822_v13, %v1254_v27 }
 0x1cf   : > { %v2824_v19 = vpop.eup %2823  ;;  %v1237_v59 = vadd.f32 %v2820_v33, %v1236_v52 }
 0x1d0   : > { %v1256_v28 = vadd.f32 %v2822_v13, %v1255_v0  ;;  %v1273_v17 = vmul.f32 %v2824_v19, %v1271_v44  ;;  %v2826_v34 = vpop.eup %2825  ;;  %vm1278_vm4 = vweird.f32 %v2824_v19 }
 0x1d1   : > { %v1241_v31 = vsel %vm1240_vm0, %v2820_v33, %v1237_v59  ;;  %v1281_v33 = vand.u32 2147483647, %v1271_v44  ;;  %vm1279_vm6 = vmor %vm1277_vm5, %vm1278_vm4 }
 0x1d2   : > { %v1246_v42 = vsel %vm1243_vm2, %v1245_v1, %v1241_v31  ;;  %v1260_v58 = vsel %vm1259_vm1, %v2822_v13, %v1256_v28  ;;  %v1274_v60 = vsub.f32 1.0, %v1273_v17  ;;  %v1284_v13 = vor.u32 1.1754944e-38, %v1283_v46 }
 0x1d3   : > { %v1265_v53 = vsel %vm1262_vm3, %v1264_v54, %v1260_v58  ;;  %v1288_v45 = vmul.f32 %v2826_v34, %v1246_v42  ;;  %vm1282_vm7 = vcmp.eq.f32.partialorder %v1281_v33, 8.507059e+37 }
 0x1d4   : > { %v1287_v4 = vmul.f32 %v1265_v53, %v3605_v29  ;;  %v1275_v22 = vmul.f32 %v2824_v19, %v1274_v60 }
 0x1d6   : > { %v3649_v32 = vadd.f32 %v1288_v45, %v1287_v4  ;;  %v1276_v5 = vadd.f32 %v2824_v19, %v1275_v22 }
 0x1d8   : > { %2827 = vtanh.f32 %v3649_v32  ;;  %v1280_v27 = vsel %vm1279_vm6, %v2824_v19, %v1276_v5  ;;  %v3913_v5 = vld [vmem:[#allocation13_spill] sm:$0xff] }
 0x1d9   : > { %v1285_v2 = vsel %vm1282_vm7, %v1284_v13, %v1280_v27 }
 0x1de   : > { %v2828_v18 = vpop.eup %2827 }
 0x1df   : > { %v1291_v52 = vmul.f32 %v2828_v18, %v1285_v2 }
 0x1e1   : > { %2640 = vst [vmem:[%s3609_s25 + $0x8] sm:$0xff] %v1291_v52  ;;  %v1301_v29 = vpack.c.bf16 %v1291_v52, %v1291_v52 }
 0x1e3   : > { %1310 = vmatmul.bf16.vlgmr.msrb.gmra.mxu0 %v1301_v29  ;;  %1323 = vmatmul.bf16.vlgmr.msrb.gmra.mxu1 %v1301_v29 }
 0x1e4   : > { %1336 = vmatmul.bf16.vlgmr.msrb.gmra.mxu2 %v1301_v29  ;;  %1349 = vmatmul.bf16.vlgmr.msrb.gmra.mxu3 %v1301_v29 }
 0x1e5   : > { %1560 = vmatpush.bf16.msrb.mxu0 %v3260_v38  ;;  %1573 = vmatpush.bf16.msrb.mxu1 %v3265_v43 }
 0x1e6   : > { %1586 = vmatpush.bf16.msrb.mxu2 %v3272_v49  ;;  %1599 = vmatpush.bf16.msrb.mxu3 %v3275_v50 }
 0x1e9   : > { %1561 = vmatpush.bf16.msrb.mxu0 %v3277_v51  ;;  %1574 = vmatpush.bf16.msrb.mxu1 %v3283_v55 }
 0x1ea   : > { %1587 = vmatpush.bf16.msrb.mxu2 %v3291_v61  ;;  %1600 = vmatpush.bf16.msrb.mxu3 %v3295_v62 }
 0x1ed   : > { %1562 = vmatpush.bf16.msrb.mxu0 %v3297_v63  ;;  %1575 = vmatpush.bf16.msrb.mxu1 %v3303_v3 }
 0x1ee   : > { %1588 = vmatpush.bf16.msrb.mxu2 %v3311_v9  ;;  %1601 = vmatpush.bf16.msrb.mxu3 %v3318_v11 }
 0x1f1   : > { %1563 = vmatpush.bf16.msrb.mxu0 %v3320_v12  ;;  %1576 = vmatpush.bf16.msrb.mxu1 %v3326_v16 }
 0x1f2   : > { %1589 = vmatpush.bf16.msrb.mxu2 %v3337_v23  ;;  %1602 = vmatpush.bf16.msrb.mxu3 %v3341_v24 }
 0x1f5   : > { %1564 = vmatpush.bf16.msrb.mxu0 %v3343_v25  ;;  %1577 = vmatpush.bf16.msrb.mxu1 %v3349_v30 }
 0x1f6   : > { %1590 = vmatpush.bf16.msrb.mxu2 %v3357_v36  ;;  %1603 = vmatpush.bf16.msrb.mxu3 %v3361_v37 }
 0x1f9   : > { %1565 = vmatpush.bf16.msrb.mxu0 %v3363_v39  ;;  %1578 = vmatpush.bf16.msrb.mxu1 %v3366_v40 }
 0x1fa   : > { %1591 = vmatpush.bf16.msrb.mxu2 %v3386_v57  ;;  %1604 = vmatpush.bf16.msrb.mxu3 %v3376_v47 }
 0x1fd   : > { %1566 = vmatpush.bf16.msrb.mxu0 %v3378_v48  ;;  %1579 = vmatpush.bf16.msrb.mxu1 %v3384_v56 }
 0x1fe   : > { %1592 = vmatpush.bf16.msrb.mxu2 %v3403_v8  ;;  %1605 = vmatpush.bf16.msrb.mxu3 %v3399_v6 }
 0x201   : > { %1567 = vmatpush.bf16.msrb.mxu0 %v3401_v7  ;;  %1580 = vmatpush.bf16.msrb.mxu1 %v3408_v14 }
 0x202   : > { %1593 = vmatpush.bf16.msrb.mxu2 %v3419_v20  ;;  %1606 = vmatpush.bf16.msrb.mxu3 %v3423_v21 }
 0x260   : > { %v1311_v44 = vpop.f32.mrf.mxu0  ;;  %v1324_v35 = vpop.f32.mrf.mxu1 }
 0x261   : > { %v1354_v0 = vadd.f32 %v1311_v44, %v3537_v10  ;;  %v1355_v41 = vadd.f32 %v1324_v35, %v3539_v15 }
 0x263   : > { %v2641_v19 = vmul.f32 -1.442695, %v1354_v0  ;;  %v2642_v59 = vmul.f32 -1.442695, %v1355_v41 }
 0x265   : > { %2829 = vpow2.f32 %v2641_v19 }
 0x266   : > { %2831 = vpow2.f32 %v2642_v59 }
 0x267   : > { %v1337_v1 = vpop.f32.mrf.mxu2  ;;  %v1350_v28 = vpop.f32.mrf.mxu3 }
 0x268   : > { %v1357_v17 = vadd.f32 %v1350_v28, %v3545_v26  ;;  %v1313_v54 = vpop.f32.mrf.mxu0  ;;  %v1326_v31 = vpop.f32.mrf.mxu1  ;;  %v1356_v46 = vadd.f32 %v1337_v1, %v3913_v5 }
 0x26a   : > { %v2643_v34 = vmul.f32 -1.442695, %v1357_v17 }
 0x26b   : > { %v2830_v42 = vpop.eup %2829 }
 0x26c   : > { %v2832_v58 = vpop.eup %2831  ;;  %v1361_v60 = vadd.f32 1.0, %v2830_v42  ;;  %2833 = vpow2.f32 %v2643_v34 }
 0x26d   : > { %v1380_v53 = vadd.f32 1.0, %v2832_v58 }
 0x26e   : > { %2835 = vrcp.f32 %v1361_v60  ;;  %v1373_v2 = vand.u32 2147483648, %v1361_v60  ;;  %v1371_v44 = vand.u32 2147483647, %v1361_v60  ;;  %vm1367_vm10 = vweird.f32 %v1361_v60 }
 0x26f   : > { %2837 = vrcp.f32 %v1380_v53  ;;  %v1339_v10 = vpop.f32.mrf.mxu2  ;;  %v1352_v15 = vpop.f32.mrf.mxu3  ;;  %v1392_v52 = vand.u32 2147483648, %v1380_v53  ;;  %v1390_v0 = vand.u32 2147483647, %v1380_v53  ;;  %vm1386_vm11 = vweird.f32 %v1380_v53 }
 0x270   : > { %v1374_v59 = vor.u32 1.1754944e-38, %v1373_v2  ;;  %vm1372_vm14 = vcmp.eq.f32.partialorder %v1371_v44, 8.507059e+37  ;;  %v3915_v44 = vld [vmem:[#allocation15_spill] sm:$0xff] }
 0x271   : > { %v1393_v17 = vor.u32 1.1754944e-38, %v1392_v52  ;;  %vm1391_vm15 = vcmp.eq.f32.partialorder %v1390_v0, 8.507059e+37  ;;  %v3914_v52 = vld [vmem:[#allocation14_spill] sm:$0xff] }
 0x272   : > { %v2834_v45 = vpop.eup %2833 }
 0x273   : > { %v1400_v4 = vadd.f32 1.0, %v2834_v45 }
 0x274   : > { %v2836_v22 = vpop.eup %2835 }
 0x275   : > { %v2838_v33 = vpop.eup %2837  ;;  %v1363_v27 = vmul.f32 %v2836_v22, %v1361_v60  ;;  %2839 = vrcp.f32 %v1400_v4  ;;  %vm1368_vm8 = vweird.f32 %v2836_v22  ;;  %vm1406_vm1 = vweird.f32 %v1400_v4 }
 0x276   : > { %v1382_v26 = vmul.f32 %v2838_v33, %v1380_v53  ;;  %2841 = vtanh.f32 %v1356_v46  ;;  %vm1387_vm9 = vweird.f32 %v2838_v33  ;;  %vm1369_vm12 = vmor %vm1367_vm10, %vm1368_vm8  ;;  %v1412_v46 = vand.u32 2147483648, %v1400_v4 }
 0x277   : > { %v1364_v13 = vsub.f32 1.0, %v1363_v27  ;;  %vm1388_vm13 = vmor %vm1386_vm11, %vm1387_vm9 }
 0x278   : > { %v1383_v18 = vsub.f32 1.0, %v1382_v26 }
 0x279   : > { %v1365_v29 = vmul.f32 %v2836_v22, %v1364_v13 }
 0x27a   : > { %v1384_v35 = vmul.f32 %v2838_v33, %v1383_v18 }
 0x27b   : > { %v2840_v41 = vpop.eup %2839  ;;  %v1366_v19 = vadd.f32 %v2836_v22, %v1365_v29 }
 0x27c   : > { %v1385_v1 = vadd.f32 %v2838_v33, %v1384_v35  ;;  %v1402_v28 = vmul.f32 %v2840_v41, %v1400_v4  ;;  %v2842_v31 = vpop.eup %2841  ;;  %vm1407_vm0 = vweird.f32 %v2840_v41 }
 0x27d   : > { %v1370_v54 = vsel %vm1369_vm12, %v2836_v22, %v1366_v19  ;;  %v1410_v22 = vand.u32 2147483647, %v1400_v4  ;;  %vm1408_vm2 = vmor %vm1406_vm1, %vm1407_vm0 }
 0x27e   : > { %v1375_v34 = vsel %vm1372_vm14, %v1374_v59, %v1370_v54  ;;  %v1389_v42 = vsel %vm1388_vm13, %v2838_v33, %v1385_v1  ;;  %v1403_v58 = vsub.f32 1.0, %v1402_v28  ;;  %v1413_v33 = vor.u32 1.1754944e-38, %v1412_v46  ;;  %v3916_v1 = vld [vmem:[#allocation17_spill] sm:$0xff] }
 0x27f   : > { %v1394_v10 = vsel %vm1391_vm15, %v1393_v17, %v1389_v42  ;;  %v1417_v15 = vmul.f32 %v2842_v31, %v1375_v34  ;;  %vm1411_vm3 = vcmp.eq.f32.partialorder %v1410_v22, 8.507059e+37  ;;  %v3917_v22 = vld [vmem:[#allocation16_spill] sm:$0xff] }
 0x280   : > { %v1416_v45 = vmul.f32 %v1394_v10, %v3649_v32  ;;  %v1404_v60 = vmul.f32 %v2840_v41, %v1403_v58 }
 0x282   : > { %v3690_v53 = vadd.f32 %v1417_v15, %v1416_v45  ;;  %v1405_v5 = vadd.f32 %v2840_v41, %v1404_v60 }
 0x284   : > { %2843 = vtanh.f32 %v3690_v53  ;;  %v1409_v27 = vsel %vm1408_vm2, %v2840_v41, %v1405_v5 }
 0x285   : > { %v1414_v13 = vsel %vm1411_vm3, %v1413_v33, %v1409_v27 }
 0x28a   : > { %v2844_v26 = vpop.eup %2843 }
 0x28b   : > { %v1420_v18 = vmul.f32 %v2844_v26, %v1414_v13 }
 0x28d   : > { %2644 = vst [vmem:[%s3609_s25 + $0x10] sm:$0xff] %v1420_v18  ;;  %v1430_v32 = vpack.c.bf16 %v1420_v18, %v1420_v18 }
 0x28f   : > { %1439 = vmatmul.bf16.vlgmr.msra.gmra.mxu0 %v1430_v32  ;;  %1452 = vmatmul.bf16.vlgmr.msra.gmra.mxu1 %v1430_v32 }
 0x290   : > { %1465 = vmatmul.bf16.vlgmr.msra.gmra.mxu2 %v1430_v32  ;;  %1478 = vmatmul.bf16.vlgmr.msra.gmra.mxu3 %v1430_v32 }
 0x291   : > { %1689 = vmatpush.bf16.msra.mxu0 %v3260_v38  ;;  %1702 = vmatpush.bf16.msra.mxu1 %v3265_v43 }
 0x292   : > { %1715 = vmatpush.bf16.msra.mxu2 %v3272_v49  ;;  %1728 = vmatpush.bf16.msra.mxu3 %v3275_v50 }
 0x295   : > { %1690 = vmatpush.bf16.msra.mxu0 %v3277_v51  ;;  %1703 = vmatpush.bf16.msra.mxu1 %v3283_v55 }
 0x296   : > { %1716 = vmatpush.bf16.msra.mxu2 %v3291_v61  ;;  %1729 = vmatpush.bf16.msra.mxu3 %v3295_v62 }
 0x299   : > { %1691 = vmatpush.bf16.msra.mxu0 %v3297_v63  ;;  %1704 = vmatpush.bf16.msra.mxu1 %v3303_v3 }
 0x29a   : > { %1717 = vmatpush.bf16.msra.mxu2 %v3311_v9  ;;  %1730 = vmatpush.bf16.msra.mxu3 %v3318_v11 }
 0x29d   : > { %1692 = vmatpush.bf16.msra.mxu0 %v3320_v12  ;;  %1705 = vmatpush.bf16.msra.mxu1 %v3326_v16 }
 0x29e   : > { %1718 = vmatpush.bf16.msra.mxu2 %v3337_v23  ;;  %1731 = vmatpush.bf16.msra.mxu3 %v3341_v24 }
 0x2a1   : > { %1693 = vmatpush.bf16.msra.mxu0 %v3343_v25  ;;  %1706 = vmatpush.bf16.msra.mxu1 %v3349_v30 }
 0x2a2   : > { %1719 = vmatpush.bf16.msra.mxu2 %v3357_v36  ;;  %1732 = vmatpush.bf16.msra.mxu3 %v3361_v37 }
 0x2a5   : > { %1694 = vmatpush.bf16.msra.mxu0 %v3363_v39  ;;  %1707 = vmatpush.bf16.msra.mxu1 %v3366_v40 }
 0x2a6   : > { %1720 = vmatpush.bf16.msra.mxu2 %v3386_v57  ;;  %1733 = vmatpush.bf16.msra.mxu3 %v3376_v47 }
 0x2a9   : > { %1695 = vmatpush.bf16.msra.mxu0 %v3378_v48  ;;  %1708 = vmatpush.bf16.msra.mxu1 %v3384_v56 }
 0x2aa   : > { %1721 = vmatpush.bf16.msra.mxu2 %v3403_v8  ;;  %1734 = vmatpush.bf16.msra.mxu3 %v3399_v6 }
 0x2ad   : > { %1696 = vmatpush.bf16.msra.mxu0 %v3401_v7  ;;  %1709 = vmatpush.bf16.msra.mxu1 %v3408_v14 }
 0x2ae   : > { %1722 = vmatpush.bf16.msra.mxu2 %v3419_v20  ;;  %1735 = vmatpush.bf16.msra.mxu3 %v3423_v21 }
 0x30c   : > { %v1440_v4 = vpop.f32.mrf.mxu0  ;;  %v1453_v2 = vpop.f32.mrf.mxu1 }
 0x30d   : > { %v1483_v29 = vadd.f32 %v1440_v4, %v3914_v52  ;;  %v1484_v35 = vadd.f32 %v1453_v2, %v3915_v44 }
 0x30f   : > { %v2645_v0 = vmul.f32 -1.442695, %v1483_v29  ;;  %v2646_v41 = vmul.f32 -1.442695, %v1484_v35 }
 0x311   : > { %2845 = vpow2.f32 %v2645_v0 }
 0x312   : > { %2847 = vpow2.f32 %v2646_v41 }
 0x313   : > { %v1466_v19 = vpop.f32.mrf.mxu2  ;;  %v1479_v59 = vpop.f32.mrf.mxu3 }
 0x314   : > { %v1486_v28 = vadd.f32 %v1479_v59, %v3916_v1  ;;  %v1442_v17 = vpop.f32.mrf.mxu0  ;;  %v1455_v54 = vpop.f32.mrf.mxu1  ;;  %v1485_v27 = vadd.f32 %v1466_v19, %v3917_v22 }
 0x316   : > { %v2647_v31 = vmul.f32 -1.442695, %v1486_v28 }
 0x317   : > { %v2846_v34 = vpop.eup %2845 }
 0x318   : > { %v2848_v42 = vpop.eup %2847  ;;  %v1490_v58 = vadd.f32 1.0, %v2846_v34  ;;  %2849 = vpow2.f32 %v2647_v31 }
 0x319   : > { %v1509_v10 = vadd.f32 1.0, %v2848_v42 }
 0x31a   : > { %2851 = vrcp.f32 %v1490_v58  ;;  %v1502_v4 = vand.u32 2147483648, %v1490_v58  ;;  %v1500_v29 = vand.u32 2147483647, %v1490_v58  ;;  %vm1496_vm6 = vweird.f32 %v1490_v58 }
 0x31b   : > { %2853 = vrcp.f32 %v1509_v10  ;;  %v1468_v15 = vpop.f32.mrf.mxu2  ;;  %v1481_v45 = vpop.f32.mrf.mxu3  ;;  %v1521_v2 = vand.u32 2147483648, %v1509_v10  ;;  %v1519_v35 = vand.u32 2147483647, %v1509_v10  ;;  %vm1515_vm7 = vweird.f32 %v1509_v10 }
 0x31c   : > { %v1503_v19 = vor.u32 1.1754944e-38, %v1502_v4  ;;  %vm1501_vm10 = vcmp.eq.f32.partialorder %v1500_v29, 8.507059e+37  ;;  %v3919_v29 = vld [vmem:[#allocation19_spill] sm:$0xff] }
 0x31d   : > { %v1522_v28 = vor.u32 1.1754944e-38, %v1521_v2  ;;  %vm1520_vm11 = vcmp.eq.f32.partialorder %v1519_v35, 8.507059e+37  ;;  %v3918_v2 = vld [vmem:[#allocation18_spill] sm:$0xff] }
 0x31e   : > { %v2850_v60 = vpop.eup %2849 }
 0x31f   : > { %v1529_v5 = vadd.f32 1.0, %v2850_v60 }
 0x320   : > { %v2852_v46 = vpop.eup %2851 }
 0x321   : > { %v2854_v33 = vpop.eup %2853  ;;  %v1492_v26 = vmul.f32 %v2852_v46, %v1490_v58  ;;  %2855 = vrcp.f32 %v1529_v5  ;;  %vm1497_vm4 = vweird.f32 %v2852_v46  ;;  %vm1535_vm13 = vweird.f32 %v1529_v5 }
 0x322   : > { %v1511_v13 = vmul.f32 %v2854_v33, %v1509_v10  ;;  %2857 = vtanh.f32 %v1485_v27  ;;  %vm1516_vm5 = vweird.f32 %v2854_v33  ;;  %vm1498_vm8 = vmor %vm1496_vm6, %vm1497_vm4  ;;  %v1541_v27 = vand.u32 2147483648, %v1529_v5 }
 0x323   : > { %v1493_v18 = vsub.f32 1.0, %v1492_v26  ;;  %vm1517_vm9 = vmor %vm1515_vm7, %vm1516_vm5 }
 0x324   : > { %v1512_v32 = vsub.f32 1.0, %v1511_v13 }
 0x325   : > { %v1494_v52 = vmul.f32 %v2852_v46, %v1493_v18 }
 0x326   : > { %v1513_v44 = vmul.f32 %v2854_v33, %v1512_v32 }
 0x327   : > { %v2856_v0 = vpop.eup %2855  ;;  %v1495_v41 = vadd.f32 %v2852_v46, %v1494_v52 }
 0x328   : > { %v1514_v59 = vadd.f32 %v2854_v33, %v1513_v44  ;;  %v1531_v1 = vmul.f32 %v2856_v0, %v1529_v5  ;;  %v2858_v54 = vpop.eup %2857  ;;  %vm1536_vm12 = vweird.f32 %v2856_v0 }
 0x329   : > { %v1499_v17 = vsel %vm1498_vm8, %v2852_v46, %v1495_v41  ;;  %v1539_v46 = vand.u32 2147483647, %v1529_v5  ;;  %vm1537_vm14 = vmor %vm1535_vm13, %vm1536_vm12 }
 0x32a   : > { %v1504_v31 = vsel %vm1501_vm10, %v1503_v19, %v1499_v17  ;;  %v1518_v34 = vsel %vm1517_vm9, %v2854_v33, %v1514_v59  ;;  %v1532_v42 = vsub.f32 1.0, %v1531_v1  ;;  %v1542_v33 = vor.u32 1.1754944e-38, %v1541_v27  ;;  %v3920_v59 = vld [vmem:[#allocation21_spill] sm:$0xff] }
 0x32b   : > { %v1523_v15 = vsel %vm1520_vm11, %v1522_v28, %v1518_v34  ;;  %v1546_v45 = vmul.f32 %v2858_v54, %v1504_v31  ;;  %vm1540_vm15 = vcmp.eq.f32.partialorder %v1539_v46, 8.507059e+37  ;;  %v3921_v46 = vld [vmem:[#allocation20_spill] sm:$0xff] }
 0x32c   : > { %v1545_v60 = vmul.f32 %v1523_v15, %v3690_v53  ;;  %v1533_v58 = vmul.f32 %v2856_v0, %v1532_v42 }
 0x32e   : > { %v3731_v10 = vadd.f32 %v1546_v45, %v1545_v60  ;;  %v1534_v22 = vadd.f32 %v2856_v0, %v1533_v58 }
 0x330   : > { %2859 = vtanh.f32 %v3731_v10  ;;  %v1538_v26 = vsel %vm1537_vm14, %v2856_v0, %v1534_v22 }
 0x331   : > { %v1543_v18 = vsel %vm1540_vm15, %v1542_v33, %v1538_v26 }
 0x336   : > { %v2860_v13 = vpop.eup %2859 }
 0x337   : > { %v1549_v32 = vmul.f32 %v2860_v13, %v1543_v18 }
 0x339   : > { %2648 = vst [vmem:[%s3609_s25 + $0x18] sm:$0xff] %v1549_v32  ;;  %v1559_v53 = vpack.c.bf16 %v1549_v32, %v1549_v32 }
 0x33b   : > { %1568 = vmatmul.bf16.vlgmr.msrb.gmra.mxu0 %v1559_v53  ;;  %1581 = vmatmul.bf16.vlgmr.msrb.gmra.mxu1 %v1559_v53 }
 0x33c   : > { %1594 = vmatmul.bf16.vlgmr.msrb.gmra.mxu2 %v1559_v53  ;;  %1607 = vmatmul.bf16.vlgmr.msrb.gmra.mxu3 %v1559_v53 }
 0x33d   : > { %1818 = vmatpush.bf16.msrb.mxu0 %v3260_v38  ;;  %1831 = vmatpush.bf16.msrb.mxu1 %v3265_v43 }
 0x33e   : > { %1844 = vmatpush.bf16.msrb.mxu2 %v3272_v49  ;;  %1857 = vmatpush.bf16.msrb.mxu3 %v3275_v50 }
 0x341   : > { %1819 = vmatpush.bf16.msrb.mxu0 %v3277_v51  ;;  %1832 = vmatpush.bf16.msrb.mxu1 %v3283_v55 }
 0x342   : > { %1845 = vmatpush.bf16.msrb.mxu2 %v3291_v61  ;;  %1858 = vmatpush.bf16.msrb.mxu3 %v3295_v62 }
 0x345   : > { %1820 = vmatpush.bf16.msrb.mxu0 %v3297_v63  ;;  %1833 = vmatpush.bf16.msrb.mxu1 %v3303_v3 }
 0x346   : > { %1846 = vmatpush.bf16.msrb.mxu2 %v3311_v9  ;;  %1859 = vmatpush.bf16.msrb.mxu3 %v3318_v11 }
 0x349   : > { %1821 = vmatpush.bf16.msrb.mxu0 %v3320_v12  ;;  %1834 = vmatpush.bf16.msrb.mxu1 %v3326_v16 }
 0x34a   : > { %1847 = vmatpush.bf16.msrb.mxu2 %v3337_v23  ;;  %1860 = vmatpush.bf16.msrb.mxu3 %v3341_v24 }
 0x34d   : > { %1822 = vmatpush.bf16.msrb.mxu0 %v3343_v25  ;;  %1835 = vmatpush.bf16.msrb.mxu1 %v3349_v30 }
 0x34e   : > { %1848 = vmatpush.bf16.msrb.mxu2 %v3357_v36  ;;  %1861 = vmatpush.bf16.msrb.mxu3 %v3361_v37 }
 0x351   : > { %1823 = vmatpush.bf16.msrb.mxu0 %v3363_v39  ;;  %1836 = vmatpush.bf16.msrb.mxu1 %v3366_v40 }
 0x352   : > { %1849 = vmatpush.bf16.msrb.mxu2 %v3386_v57  ;;  %1862 = vmatpush.bf16.msrb.mxu3 %v3376_v47 }
 0x355   : > { %1824 = vmatpush.bf16.msrb.mxu0 %v3378_v48  ;;  %1837 = vmatpush.bf16.msrb.mxu1 %v3384_v56 }
 0x356   : > { %1850 = vmatpush.bf16.msrb.mxu2 %v3403_v8  ;;  %1863 = vmatpush.bf16.msrb.mxu3 %v3399_v6 }
 0x359   : > { %1825 = vmatpush.bf16.msrb.mxu0 %v3401_v7  ;;  %1838 = vmatpush.bf16.msrb.mxu1 %v3408_v14 }
 0x35a   : > { %1851 = vmatpush.bf16.msrb.mxu2 %v3419_v20  ;;  %1864 = vmatpush.bf16.msrb.mxu3 %v3423_v21 }
 0x3b8   : > { %v1569_v5 = vpop.f32.mrf.mxu0  ;;  %v1582_v4 = vpop.f32.mrf.mxu1 }
 0x3b9   : > { %v1612_v52 = vadd.f32 %v1569_v5, %v3918_v2  ;;  %v1613_v44 = vadd.f32 %v1582_v4, %v3919_v29 }
 0x3bb   : > { %v2649_v35 = vmul.f32 -1.442695, %v1612_v52  ;;  %v2650_v0 = vmul.f32 -1.442695, %v1613_v44 }
 0x3bd   : > { %2861 = vpow2.f32 %v2649_v35 }
 0x3be   : > { %2863 = vpow2.f32 %v2650_v0 }
 0x3bf   : > { %v1595_v41 = vpop.f32.mrf.mxu2  ;;  %v1608_v19 = vpop.f32.mrf.mxu3 }
 0x3c0   : > { %v1615_v1 = vadd.f32 %v1608_v19, %v3920_v59  ;;  %v1571_v28 = vpop.f32.mrf.mxu0  ;;  %v1584_v17 = vpop.f32.mrf.mxu1  ;;  %v1614_v26 = vadd.f32 %v1595_v41, %v3921_v46 }
 0x3c2   : > { %v2651_v54 = vmul.f32 -1.442695, %v1615_v1 }
 0x3c3   : > { %v2862_v31 = vpop.eup %2861 }
 0x3c4   : > { %v2864_v34 = vpop.eup %2863  ;;  %v1619_v42 = vadd.f32 1.0, %v2862_v31  ;;  %2865 = vpow2.f32 %v2651_v54 }
 0x3c5   : > { %v1638_v15 = vadd.f32 1.0, %v2864_v34 }
 0x3c6   : > { %2867 = vrcp.f32 %v1619_v42  ;;  %v1631_v5 = vand.u32 2147483648, %v1619_v42  ;;  %v1629_v52 = vand.u32 2147483647, %v1619_v42  ;;  %vm1625_vm2 = vweird.f32 %v1619_v42 }
 0x3c7   : > { %2869 = vrcp.f32 %v1638_v15  ;;  %v1597_v45 = vpop.f32.mrf.mxu2  ;;  %v1610_v60 = vpop.f32.mrf.mxu3  ;;  %v1650_v4 = vand.u32 2147483648, %v1638_v15  ;;  %v1648_v44 = vand.u32 2147483647, %v1638_v15  ;;  %vm1644_vm3 = vweird.f32 %v1638_v15 }
 0x3c8   : > { %v1632_v41 = vor.u32 1.1754944e-38, %v1631_v5  ;;  %vm1630_vm6 = vcmp.eq.f32.partialorder %v1629_v52, 8.507059e+37 }
 0x3c9   : > { %v1651_v1 = vor.u32 1.1754944e-38, %v1650_v4  ;;  %vm1649_vm7 = vcmp.eq.f32.partialorder %v1648_v44, 8.507059e+37 }
 0x3ca   : > { %v2866_v58 = vpop.eup %2865 }
 0x3cb   : > { %v1658_v22 = vadd.f32 1.0, %v2866_v58 }
 0x3cc   : > { %v2868_v27 = vpop.eup %2867 }
 0x3cd   : > { %v2870_v33 = vpop.eup %2869  ;;  %v1621_v13 = vmul.f32 %v2868_v27, %v1619_v42  ;;  %2871 = vrcp.f32 %v1658_v22  ;;  %vm1626_vm0 = vweird.f32 %v2868_v27  ;;  %vm1664_vm9 = vweird.f32 %v1658_v22 }
 0x3ce   : > { %v1640_v18 = vmul.f32 %v2870_v33, %v1638_v15  ;;  %2873 = vtanh.f32 %v1614_v26  ;;  %vm1645_vm1 = vweird.f32 %v2870_v33  ;;  %vm1627_vm4 = vmor %vm1625_vm2, %vm1626_vm0  ;;  %v1670_v26 = vand.u32 2147483648, %v1658_v22 }
 0x3cf   : > { %v1622_v32 = vsub.f32 1.0, %v1621_v13  ;;  %vm1646_vm5 = vmor %vm1644_vm3, %vm1645_vm1 }
 0x3d0   : > { %v1641_v53 = vsub.f32 1.0, %v1640_v18 }
 0x3d1   : > { %v1623_v2 = vmul.f32 %v2868_v27, %v1622_v32 }
 0x3d2   : > { %v1642_v29 = vmul.f32 %v2870_v33, %v1641_v53 }
 0x3d3   : > { %v2872_v35 = vpop.eup %2871  ;;  %v1624_v0 = vadd.f32 %v2868_v27, %v1623_v2 }
 0x3d4   : > { %v1643_v19 = vadd.f32 %v2870_v33, %v1642_v29  ;;  %v1660_v59 = vmul.f32 %v2872_v35, %v1658_v22  ;;  %v2874_v17 = vpop.eup %2873  ;;  %vm1665_vm8 = vweird.f32 %v2872_v35 }
 0x3d5   : > { %v1628_v28 = vsel %vm1627_vm4, %v2868_v27, %v1624_v0  ;;  %v1668_v27 = vand.u32 2147483647, %v1658_v22  ;;  %vm1666_vm10 = vmor %vm1664_vm9, %vm1665_vm8 }
 0x3d6   : > { %v1633_v54 = vsel %vm1630_vm6, %v1632_v41, %v1628_v28  ;;  %v1647_v31 = vsel %vm1646_vm5, %v2870_v33, %v1643_v19  ;;  %v1661_v34 = vsub.f32 1.0, %v1660_v59  ;;  %v1671_v33 = vor.u32 1.1754944e-38, %v1670_v26 }
 0x3d7   : > { %v1652_v45 = vsel %vm1649_vm7, %v1651_v1, %v1647_v31  ;;  %v1675_v60 = vmul.f32 %v2874_v17, %v1633_v54  ;;  %vm1669_vm11 = vcmp.eq.f32.partialorder %v1668_v27, 8.507059e+37 }
 0x3d8   : > { %v1674_v58 = vmul.f32 %v1652_v45, %v3731_v10  ;;  %v1662_v42 = vmul.f32 %v2872_v35, %v1661_v34 }
 0x3da   : > { %v3772_v15 = vadd.f32 %v1675_v60, %v1674_v58  ;;  %v1663_v46 = vadd.f32 %v2872_v35, %v1662_v42 }
 0x3dc   : > { %2875 = vtanh.f32 %v3772_v15  ;;  %v1667_v13 = vsel %vm1666_vm10, %v2872_v35, %v1663_v46 }
 0x3dd   : > { %v1672_v32 = vsel %vm1669_vm11, %v1671_v33, %v1667_v13 }
 0x3e2   : > { %v2876_v18 = vpop.eup %2875 }
 0x3e3   : > { %v1678_v53 = vmul.f32 %v2876_v18, %v1672_v32 }
 0x3e5   : > { %2652 = vst [vmem:[%s3609_s25 + $0x20] sm:$0xff] %v1678_v53  ;;  %v1688_v10 = vpack.c.bf16 %v1678_v53, %v1678_v53 }
 0x3e7   : > { %1697 = vmatmul.bf16.vlgmr.msra.gmra.mxu0 %v1688_v10  ;;  %1710 = vmatmul.bf16.vlgmr.msra.gmra.mxu1 %v1688_v10 }
 0x3e8   : > { %1723 = vmatmul.bf16.vlgmr.msra.gmra.mxu2 %v1688_v10  ;;  %1736 = vmatmul.bf16.vlgmr.msra.gmra.mxu3 %v1688_v10 }
 0x3e9   : > { %1947 = vmatpush.bf16.msra.mxu0 %v3260_v38  ;;  %1960 = vmatpush.bf16.msra.mxu1 %v3265_v43 }
 0x3ea   : > { %1973 = vmatpush.bf16.msra.mxu2 %v3272_v49  ;;  %1986 = vmatpush.bf16.msra.mxu3 %v3275_v50  ;;  %v3922_v49 = vld [vmem:[#allocation22_spill] sm:$0xff] }
 0x3ed   : > { %1948 = vmatpush.bf16.msra.mxu0 %v3277_v51  ;;  %1961 = vmatpush.bf16.msra.mxu1 %v3283_v55  ;;  %v3923_v51 = vld [vmem:[#allocation23_spill] sm:$0xff] }
 0x3ee   : > { %1974 = vmatpush.bf16.msra.mxu2 %v3291_v61  ;;  %1987 = vmatpush.bf16.msra.mxu3 %v3295_v62 }
 0x3f1   : > { %1949 = vmatpush.bf16.msra.mxu0 %v3297_v63  ;;  %1962 = vmatpush.bf16.msra.mxu1 %v3303_v3 }
 0x3f2   : > { %1975 = vmatpush.bf16.msra.mxu2 %v3311_v9  ;;  %1988 = vmatpush.bf16.msra.mxu3 %v3318_v11  ;;  %v3924_v9 = vld [vmem:[#allocation25_spill] sm:$0xff] }
 0x3f5   : > { %1950 = vmatpush.bf16.msra.mxu0 %v3320_v12  ;;  %1963 = vmatpush.bf16.msra.mxu1 %v3326_v16 }
 0x3f6   : > { %1976 = vmatpush.bf16.msra.mxu2 %v3337_v23  ;;  %1989 = vmatpush.bf16.msra.mxu3 %v3341_v24 }
 0x3f9   : > { %1951 = vmatpush.bf16.msra.mxu0 %v3343_v25  ;;  %1964 = vmatpush.bf16.msra.mxu1 %v3349_v30 }
 0x3fa   : > { %1977 = vmatpush.bf16.msra.mxu2 %v3357_v36  ;;  %1990 = vmatpush.bf16.msra.mxu3 %v3361_v37 }
 0x3fd   : > { %1952 = vmatpush.bf16.msra.mxu0 %v3363_v39  ;;  %1965 = vmatpush.bf16.msra.mxu1 %v3366_v40 }
 0x3fe   : > { %1978 = vmatpush.bf16.msra.mxu2 %v3386_v57  ;;  %1991 = vmatpush.bf16.msra.mxu3 %v3376_v47 }
 0x401   : > { %1953 = vmatpush.bf16.msra.mxu0 %v3378_v48  ;;  %1966 = vmatpush.bf16.msra.mxu1 %v3384_v56  ;;  %v3925_v56 = vld [vmem:[#allocation24_spill] sm:$0xff] }
 0x402   : > { %1979 = vmatpush.bf16.msra.mxu2 %v3403_v8  ;;  %1992 = vmatpush.bf16.msra.mxu3 %v3399_v6 }
 0x405   : > { %1954 = vmatpush.bf16.msra.mxu0 %v3401_v7  ;;  %1967 = vmatpush.bf16.msra.mxu1 %v3408_v14 }
 0x406   : > { %1980 = vmatpush.bf16.msra.mxu2 %v3419_v20  ;;  %1993 = vmatpush.bf16.msra.mxu3 %v3423_v21 }
 0x464   : > { %v1698_v38 = vpop.f32.mrf.mxu0  ;;  %v1711_v43 = vpop.f32.mrf.mxu1 }
 0x465   : > { %v1741_v50 = vadd.f32 %v1698_v38, %v3922_v49  ;;  %v1742_v55 = vadd.f32 %v1711_v43, %v3923_v51  ;;  %v3926_v38 = vld [vmem:[#allocation26_spill] sm:$0xff]  ;;  %v3927_v49 = vld [vmem:[#allocation27_spill] sm:$0xff] }
 0x467   : > { %v2653_v61 = vmul.f32 -1.442695, %v1741_v50  ;;  %v2654_v62 = vmul.f32 -1.442695, %v1742_v55 }
 0x469   : > { %2877 = vpow2.f32 %v2653_v61 }
 0x46a   : > { %2879 = vpow2.f32 %v2654_v62 }
 0x46b   : > { %v1724_v63 = vpop.f32.mrf.mxu2  ;;  %v1737_v3 = vpop.f32.mrf.mxu3 }
 0x46c   : > { %v1744_v11 = vadd.f32 %v1737_v3, %v3924_v9  ;;  %v1700_v12 = vpop.f32.mrf.mxu0  ;;  %v1713_v16 = vpop.f32.mrf.mxu1  ;;  %v1743_v57 = vadd.f32 %v1724_v63, %v3925_v56  ;;  %v3928_v63 = vld [vmem:[#allocation29_spill] sm:$0xff] }
 0x46e   : > { %v2655_v23 = vmul.f32 -1.442695, %v1744_v11 }
 0x46f   : > { %v2878_v24 = vpop.eup %2877 }
 0x470   : > { %v2880_v25 = vpop.eup %2879  ;;  %v1748_v30 = vadd.f32 1.0, %v2878_v24  ;;  %2881 = vpow2.f32 %v2655_v23 }
 0x471   : > { %v1767_v36 = vadd.f32 1.0, %v2880_v25 }
 0x472   : > { %2883 = vrcp.f32 %v1748_v30  ;;  %v1760_v21 = vand.u32 2147483648, %v1748_v30  ;;  %v1758_v4 = vand.u32 2147483647, %v1748_v30  ;;  %vm1754_vm14 = vweird.f32 %v1748_v30 }
 0x473   : > { %2885 = vrcp.f32 %v1767_v36  ;;  %v1726_v37 = vpop.f32.mrf.mxu2  ;;  %v1739_v39 = vpop.f32.mrf.mxu3  ;;  %v1779_v22 = vand.u32 2147483648, %v1767_v36  ;;  %v1777_v52 = vand.u32 2147483647, %v1767_v36  ;;  %vm1773_vm15 = vweird.f32 %v1767_v36 }
 0x474   : > { %v1761_v35 = vor.u32 1.1754944e-38, %v1760_v21  ;;  %vm1759_vm2 = vcmp.eq.f32.partialorder %v1758_v4, 8.507059e+37 }
 0x475   : > { %v1780_v19 = vor.u32 1.1754944e-38, %v1779_v22  ;;  %vm1778_vm3 = vcmp.eq.f32.partialorder %v1777_v52, 8.507059e+37 }
 0x476   : > { %v2882_v40 = vpop.eup %2881 }
 0x477   : > { %v1787_v47 = vadd.f32 1.0, %v2882_v40 }
 0x478   : > { %v2884_v48 = vpop.eup %2883 }
 0x479   : > { %v2886_v6 = vpop.eup %2885  ;;  %v1750_v7 = vmul.f32 %v2884_v48, %v1748_v30  ;;  %2887 = vrcp.f32 %v1787_v47  ;;  %vm1755_vm12 = vweird.f32 %v2884_v48  ;;  %v1799_v46 = vand.u32 2147483648, %v1787_v47 }
 0x47a   : > { %v1769_v8 = vmul.f32 %v2886_v6, %v1767_v36  ;;  %2889 = vtanh.f32 %v1743_v57  ;;  %vm1774_vm13 = vweird.f32 %v2886_v6  ;;  %vm1756_vm0 = vmor %vm1754_vm14, %vm1755_vm12  ;;  %vm1793_vm5 = vweird.f32 %v1787_v47 }
 0x47b   : > { %v1751_v14 = vsub.f32 1.0, %v1750_v7  ;;  %vm1775_vm1 = vmor %vm1773_vm15, %vm1774_vm13  ;;  %v1797_v26 = vand.u32 2147483647, %v1787_v47  ;;  %v1800_v13 = vor.u32 1.1754944e-38, %v1799_v46 }
 0x47c   : > { %v1770_v20 = vsub.f32 1.0, %v1769_v8 }
 0x47d   : > { %v1752_v5 = vmul.f32 %v2884_v48, %v1751_v14  ;;  %vm1798_vm7 = vcmp.eq.f32.partialorder %v1797_v26, 8.507059e+37 }
 0x47e   : > { %v1771_v2 = vmul.f32 %v2886_v6, %v1770_v20 }
 0x47f   : > { %v2888_v29 = vpop.eup %2887  ;;  %v1753_v44 = vadd.f32 %v2884_v48, %v1752_v5 }
 0x480   : > { %v1772_v0 = vadd.f32 %v2886_v6, %v1771_v2  ;;  %v1789_v41 = vmul.f32 %v2888_v29, %v1787_v47  ;;  %v2890_v1 = vpop.eup %2889  ;;  %vm1794_vm4 = vweird.f32 %v2888_v29  ;;  %v3929_v47 = vld [vmem:[#allocation28_spill] sm:$0xff] }
 0x481   : > { %v1757_v59 = vsel %vm1756_vm0, %v2884_v48, %v1753_v44  ;;  %vm1795_vm6 = vmor %vm1793_vm5, %vm1794_vm4 }
 0x482   : > { %v1762_v28 = vsel %vm1759_vm2, %v1761_v35, %v1757_v59  ;;  %v1776_v17 = vsel %vm1775_vm1, %v2886_v6, %v1772_v0  ;;  %v1790_v54 = vsub.f32 1.0, %v1789_v41 }
 0x483   : > { %v1781_v31 = vsel %vm1778_vm3, %v1780_v19, %v1776_v17  ;;  %v1804_v34 = vmul.f32 %v2890_v1, %v1762_v28 }
 0x484   : > { %v1803_v45 = vmul.f32 %v1781_v31, %v3772_v15  ;;  %v1791_v60 = vmul.f32 %v2888_v29, %v1790_v54 }
 0x486   : > { %v3813_v58 = vadd.f32 %v1804_v34, %v1803_v45  ;;  %v1792_v42 = vadd.f32 %v2888_v29, %v1791_v60 }
 0x488   : > { %2891 = vtanh.f32 %v3813_v58  ;;  %v1796_v27 = vsel %vm1795_vm6, %v2888_v29, %v1792_v42 }
 0x489   : > { %v1801_v18 = vsel %vm1798_vm7, %v1800_v13, %v1796_v27 }
 0x48e   : > { %v2892_v33 = vpop.eup %2891 }
 0x48f   : > { %v1807_v32 = vmul.f32 %v2892_v33, %v1801_v18 }
 0x491   : > { %2656 = vst [vmem:[%s3609_s25 + $0x28] sm:$0xff] %v1807_v32  ;;  %v1817_v15 = vpack.c.bf16 %v1807_v32, %v1807_v32 }
 0x493   : > { %1826 = vmatmul.bf16.vlgmr.msrb.gmra.mxu0 %v1817_v15  ;;  %1839 = vmatmul.bf16.vlgmr.msrb.gmra.mxu1 %v1817_v15 }
 0x494   : > { %1852 = vmatmul.bf16.vlgmr.msrb.gmra.mxu2 %v1817_v15  ;;  %1865 = vmatmul.bf16.vlgmr.msrb.gmra.mxu3 %v1817_v15 }
 0x510   : > { %v1827_v53 = vpop.f32.mrf.mxu0  ;;  %v1840_v10 = vpop.f32.mrf.mxu1 }
 0x511   : > { %v1870_v43 = vadd.f32 %v1827_v53, %v3926_v38  ;;  %v1871_v50 = vadd.f32 %v1840_v10, %v3927_v49  ;;  %v3930_v53 = vld [vmem:[#allocation30_spill] sm:$0xff]  ;;  %v3931_v38 = vld [vmem:[#allocation31_spill] sm:$0xff] }
 0x513   : > { %v2657_v51 = vmul.f32 -1.442695, %v1870_v43  ;;  %v2658_v55 = vmul.f32 -1.442695, %v1871_v50 }
 0x515   : > { %2893 = vpow2.f32 %v2657_v51 }
 0x516   : > { %2895 = vpow2.f32 %v2658_v55 }
 0x517   : > { %v1853_v61 = vpop.f32.mrf.mxu2  ;;  %v1866_v62 = vpop.f32.mrf.mxu3 }
 0x518   : > { %v1873_v3 = vadd.f32 %v1866_v62, %v3928_v63  ;;  %v1829_v9 = vpop.f32.mrf.mxu0  ;;  %v1842_v11 = vpop.f32.mrf.mxu1  ;;  %v1872_v48 = vadd.f32 %v1853_v61, %v3929_v47  ;;  %v3932_v61 = vld [vmem:[#allocation33_spill] sm:$0xff] }
 0x51a   : > { %v2659_v12 = vmul.f32 -1.442695, %v1873_v3 }
 0x51b   : > { %v2894_v16 = vpop.eup %2893 }
 0x51c   : > { %v2896_v23 = vpop.eup %2895  ;;  %v1877_v24 = vadd.f32 1.0, %v2894_v16  ;;  %2897 = vpow2.f32 %v2659_v12 }
 0x51d   : > { %v1896_v25 = vadd.f32 1.0, %v2896_v23 }
 0x51e   : > { %2899 = vrcp.f32 %v1877_v24  ;;  %v1889_v14 = vand.u32 2147483648, %v1877_v24  ;;  %v1887_v22 = vand.u32 2147483647, %v1877_v24  ;;  %vm1883_vm10 = vweird.f32 %v1877_v24 }
 0x51f   : > { %2901 = vrcp.f32 %v1896_v25  ;;  %v1855_v30 = vpop.f32.mrf.mxu2  ;;  %v1868_v36 = vpop.f32.mrf.mxu3  ;;  %v1908_v20 = vand.u32 2147483648, %v1896_v25  ;;  %v1906_v4 = vand.u32 2147483647, %v1896_v25  ;;  %vm1902_vm11 = vweird.f32 %v1896_v25 }
 0x520   : > { %v1890_v29 = vor.u32 1.1754944e-38, %v1889_v14  ;;  %vm1888_vm14 = vcmp.eq.f32.partialorder %v1887_v22, 8.507059e+37 }
 0x521   : > { %v1909_v0 = vor.u32 1.1754944e-38, %v1908_v20  ;;  %vm1907_vm15 = vcmp.eq.f32.partialorder %v1906_v4, 8.507059e+37 }
 0x522   : > { %v2898_v37 = vpop.eup %2897 }
 0x523   : > { %v1916_v39 = vadd.f32 1.0, %v2898_v37 }
 0x524   : > { %v2900_v40 = vpop.eup %2899 }
 0x525   : > { %v2902_v56 = vpop.eup %2901  ;;  %v1879_v57 = vmul.f32 %v2900_v40, %v1877_v24  ;;  %2903 = vrcp.f32 %v1916_v39  ;;  %vm1884_vm8 = vweird.f32 %v2900_v40  ;;  %v1928_v42 = vand.u32 2147483648, %v1916_v39 }
 0x526   : > { %v1898_v6 = vmul.f32 %v2902_v56, %v1896_v25  ;;  %2905 = vtanh.f32 %v1872_v48  ;;  %vm1903_vm9 = vweird.f32 %v2902_v56  ;;  %vm1885_vm12 = vmor %vm1883_vm10, %vm1884_vm8  ;;  %vm1922_vm1 = vweird.f32 %v1916_v39 }
 0x527   : > { %v1880_v7 = vsub.f32 1.0, %v1879_v57  ;;  %vm1904_vm13 = vmor %vm1902_vm11, %vm1903_vm9  ;;  %v1926_v46 = vand.u32 2147483647, %v1916_v39  ;;  %v1929_v27 = vor.u32 1.1754944e-38, %v1928_v42 }
 0x528   : > { %v1899_v8 = vsub.f32 1.0, %v1898_v6 }
 0x529   : > { %v1881_v21 = vmul.f32 %v2900_v40, %v1880_v7  ;;  %vm1927_vm3 = vcmp.eq.f32.partialorder %v1926_v46, 8.507059e+37 }
 0x52a   : > { %v1900_v5 = vmul.f32 %v2902_v56, %v1899_v8 }
 0x52b   : > { %v2904_v2 = vpop.eup %2903  ;;  %v1882_v52 = vadd.f32 %v2900_v40, %v1881_v21 }
 0x52c   : > { %v1901_v44 = vadd.f32 %v2902_v56, %v1900_v5  ;;  %v1918_v35 = vmul.f32 %v2904_v2, %v1916_v39  ;;  %v2906_v19 = vpop.eup %2905  ;;  %vm1923_vm0 = vweird.f32 %v2904_v2  ;;  %v3933_v39 = vld [vmem:[#allocation32_spill] sm:$0xff] }
 0x52d   : > { %v1886_v41 = vsel %vm1885_vm12, %v2900_v40, %v1882_v52  ;;  %vm1924_vm2 = vmor %vm1922_vm1, %vm1923_vm0 }
 0x52e   : > { %v1891_v59 = vsel %vm1888_vm14, %v1890_v29, %v1886_v41  ;;  %v1905_v1 = vsel %vm1904_vm13, %v2902_v56, %v1901_v44  ;;  %v1919_v28 = vsub.f32 1.0, %v1918_v35 }
 0x52f   : > { %v1910_v17 = vsel %vm1907_vm15, %v1909_v0, %v1905_v1  ;;  %v1933_v54 = vmul.f32 %v2906_v19, %v1891_v59 }
 0x530   : > { %v1932_v31 = vmul.f32 %v1910_v17, %v3813_v58  ;;  %v1920_v34 = vmul.f32 %v2904_v2, %v1919_v28 }
 0x532   : > { %v3822_v45 = vadd.f32 %v1933_v54, %v1932_v31  ;;  %v1921_v60 = vadd.f32 %v2904_v2, %v1920_v34 }
 0x534   : > { %2907 = vtanh.f32 %v3822_v45  ;;  %v1925_v26 = vsel %vm1924_vm2, %v2904_v2, %v1921_v60 }
 0x535   : > { %v1930_v33 = vsel %vm1927_vm3, %v1929_v27, %v1925_v26 }
 0x53a   : > { %v2908_v13 = vpop.eup %2907 }
 0x53b   : > { %v1936_v18 = vmul.f32 %v2908_v13, %v1930_v33  ;;  %v2132_v33 = vld [vmem:[%s3609_s25] sm:$0xff] (%p3138_p9) }
 0x53c   : > { %2133 = vst [vmem:[%s2089_s21] sm:$0xff] (%p3138_p9), %v2132_v33 }
 0x53d   : > { %2660 = vst [vmem:[%s3609_s25 + $0x30] sm:$0xff] %v1936_v18  ;;  %v1946_v58 = vpack.c.bf16 %v1936_v18, %v1936_v18  ;;  %v2134_v18 = vld [vmem:[%s3609_s25 + $0x8] sm:$0xff] (%p3138_p9) }
 0x53e   : > { %2135 = vst [vmem:[%s2089_s21 + $0x10] sm:$0xff] (%p3138_p9), %v2134_v18 }
 0x53f   : > { %1955 = vmatmul.bf16.vlgmr.msra.gmra.mxu0 %v1946_v58  ;;  %1968 = vmatmul.bf16.vlgmr.msra.gmra.mxu1 %v1946_v58 }
 0x540   : > { %1981 = vmatmul.bf16.vlgmr.msra.gmra.mxu2 %v1946_v58  ;;  %1994 = vmatmul.bf16.vlgmr.msra.gmra.mxu3 %v1946_v58  ;;  %v2136_v58 = vld [vmem:[%s3609_s25 + $0x10] sm:$0xff] (%p3138_p9) }
 0x541   : > { %2137 = vst [vmem:[%s2089_s21 + $0x20] sm:$0xff] (%p3138_p9), %v2136_v58 }
 0x5bc   : > { %v1956_v32 = vpop.f32.mrf.mxu0  ;;  %v1969_v15 = vpop.f32.mrf.mxu1 }
 0x5bd   : > { %v1999_v10 = vadd.f32 %v1956_v32, %v3930_v53  ;;  %v2000_v43 = vadd.f32 %v1969_v15, %v3931_v38  ;;  %v2138_v32 = vld [vmem:[%s3609_s25 + $0x18] sm:$0xff] (%p3138_p9)  ;;  %v2140_v15 = vld [vmem:[%s3609_s25 + $0x20] sm:$0xff] (%p3138_p9)  ;;  %v2142_v53 = vld [vmem:[%s3609_s25 + $0x28] sm:$0xff] (%p3138_p9) }
 0x5be   : > { %2139 = vst [vmem:[%s2089_s21 + $0x30] sm:$0xff] (%p3138_p9), %v2138_v32 }
 0x5bf   : > { %v2661_v49 = vmul.f32 -1.442695, %v1999_v10  ;;  %v2662_v50 = vmul.f32 -1.442695, %v2000_v43  ;;  %v2144_v10 = vld [vmem:[%s3609_s25 + $0x30] sm:$0xff] (%p3138_p9)  ;;  %2141 = vst [vmem:[%s2089_s21 + $0x40] sm:$0xff] (%p3138_p9), %v2140_v15 }
 0x5c0   : > { %2143 = vst [vmem:[%s2089_s21 + $0x50] sm:$0xff] (%p3138_p9), %v2142_v53 }
 0x5c1   : > { %2909 = vpow2.f32 %v2661_v49  ;;  %2145 = vst [vmem:[%s2089_s21 + $0x60] sm:$0xff] (%p3138_p9), %v2144_v10 }
 0x5c2   : > { %2911 = vpow2.f32 %v2662_v50 }
 0x5c3   : > { %v1982_v51 = vpop.f32.mrf.mxu2  ;;  %v1995_v55 = vpop.f32.mrf.mxu3 }
 0x5c4   : > { %v2002_v62 = vadd.f32 %v1995_v55, %v3932_v61  ;;  %v1958_v63 = vpop.f32.mrf.mxu0  ;;  %v1971_v3 = vpop.f32.mrf.mxu1  ;;  %v2001_v40 = vadd.f32 %v1982_v51, %v3933_v39 }
 0x5c6   : > { %v2663_v9 = vmul.f32 -1.442695, %v2002_v62 }
 0x5c7   : > { %v2910_v11 = vpop.eup %2909 }
 0x5c8   : > { %v2912_v12 = vpop.eup %2911  ;;  %v2006_v16 = vadd.f32 1.0, %v2910_v11  ;;  %2913 = vpow2.f32 %v2663_v9 }
 0x5c9   : > { %v2025_v23 = vadd.f32 1.0, %v2912_v12 }
 0x5ca   : > { %2915 = vrcp.f32 %v2006_v16  ;;  %v2018_v7 = vand.u32 2147483648, %v2006_v16  ;;  %v2016_v20 = vand.u32 2147483647, %v2006_v16  ;;  %vm2012_vm6 = vweird.f32 %v2006_v16 }
 0x5cb   : > { %2917 = vrcp.f32 %v2025_v23  ;;  %v1984_v24 = vpop.f32.mrf.mxu2  ;;  %v1997_v25 = vpop.f32.mrf.mxu3  ;;  %v2037_v8 = vand.u32 2147483648, %v2025_v23  ;;  %v2035_v22 = vand.u32 2147483647, %v2025_v23  ;;  %vm2031_vm7 = vweird.f32 %v2025_v23 }
 0x5cc   : > { %v2019_v2 = vor.u32 1.1754944e-38, %v2018_v7  ;;  %vm2017_vm10 = vcmp.eq.f32.partialorder %v2016_v20, 8.507059e+37 }
 0x5cd   : > { %v2038_v44 = vor.u32 1.1754944e-38, %v2037_v8  ;;  %vm2036_vm11 = vcmp.eq.f32.partialorder %v2035_v22, 8.507059e+37 }
 0x5ce   : > { %v2914_v30 = vpop.eup %2913 }
 0x5cf   : > { %v2045_v36 = vadd.f32 1.0, %v2914_v30 }
 0x5d0   : > { %v2916_v37 = vpop.eup %2915 }
 0x5d1   : > { %v2918_v47 = vpop.eup %2917  ;;  %v2008_v48 = vmul.f32 %v2916_v37, %v2006_v16  ;;  %2919 = vrcp.f32 %v2045_v36  ;;  %vm2013_vm4 = vweird.f32 %v2916_v37  ;;  %v2057_v60 = vand.u32 2147483648, %v2045_v36 }
 0x5d2   : > { %v2027_v56 = vmul.f32 %v2918_v47, %v2025_v23  ;;  %2921 = vtanh.f32 %v2001_v40  ;;  %vm2032_vm5 = vweird.f32 %v2918_v47  ;;  %vm2014_vm8 = vmor %vm2012_vm6, %vm2013_vm4  ;;  %vm2051_vm13 = vweird.f32 %v2045_v36 }
 0x5d3   : > { %v2009_v57 = vsub.f32 1.0, %v2008_v48  ;;  %vm2033_vm9 = vmor %vm2031_vm7, %vm2032_vm5  ;;  %v2055_v42 = vand.u32 2147483647, %v2045_v36  ;;  %v2058_v26 = vor.u32 1.1754944e-38, %v2057_v60 }
 0x5d4   : > { %v2028_v6 = vsub.f32 1.0, %v2027_v56 }
 0x5d5   : > { %v2010_v14 = vmul.f32 %v2916_v37, %v2009_v57  ;;  %vm2056_vm15 = vcmp.eq.f32.partialorder %v2055_v42, 8.507059e+37 }
 0x5d6   : > { %v2029_v21 = vmul.f32 %v2918_v47, %v2028_v6 }
 0x5d7   : > { %v2920_v5 = vpop.eup %2919  ;;  %v2011_v4 = vadd.f32 %v2916_v37, %v2010_v14 }
 0x5d8   : > { %v2030_v52 = vadd.f32 %v2918_v47, %v2029_v21  ;;  %v2047_v29 = vmul.f32 %v2920_v5, %v2045_v36  ;;  %v2922_v0 = vpop.eup %2921  ;;  %vm2052_vm12 = vweird.f32 %v2920_v5 }
 0x5d9   : > { %v2015_v35 = vsel %vm2014_vm8, %v2916_v37, %v2011_v4  ;;  %vm2053_vm14 = vmor %vm2051_vm13, %vm2052_vm12 }
 0x5da   : > { %v2020_v41 = vsel %vm2017_vm10, %v2019_v2, %v2015_v35  ;;  %v2034_v19 = vsel %vm2033_vm9, %v2918_v47, %v2030_v52  ;;  %v2048_v59 = vsub.f32 1.0, %v2047_v29 }
 0x5db   : > { %v2039_v1 = vsel %vm2036_vm11, %v2038_v44, %v2034_v19  ;;  %v2062_v28 = vmul.f32 %v2922_v0, %v2020_v41 }
 0x5dc   : > { %v2061_v17 = vmul.f32 %v2039_v1, %v3822_v45  ;;  %v2049_v54 = vmul.f32 %v2920_v5, %v2048_v59 }
 0x5de   : > { %v2063_v31 = vadd.f32 %v2062_v28, %v2061_v17  ;;  %v2050_v34 = vadd.f32 %v2920_v5, %v2049_v54 }
 0x5e0   : > { %2923 = vtanh.f32 %v2063_v31  ;;  %2069 = vst [vmem:[%s472_s13] sm:$0xff] %v2063_v31  ;;  %v2054_v46 = vsel %vm2053_vm14, %v2920_v5, %v2050_v34 }
 0x5e1   : > { %v2059_v27 = vsel %vm2056_vm15, %v2058_v26, %v2054_v46 }
 0x5e6   : > { %v2924_v45 = vpop.eup %2923  ;;  %2084 = sbr.rel (!%p3138_p9) target bundleno = 1522 (0x5f2), region = 60 }
 0x5e7   : > { %v2065_v13 = vmul.f32 %v2924_v45, %v2059_v27 }
 0x5e9   : > { %2664 = vst [vmem:[%s3609_s25 + $0x38] sm:$0xff] %v2065_v13 }
 0x5ea   : > { %2068 = vst [vmem:[%s468_s12] sm:$0xff] %v2065_v13 }
 0x5f0   : > { %v2146_v38 = vld [vmem:[%s3609_s25 + $0x38] sm:$0xff] }
 0x5f1   : > { %2147 = vst [vmem:[%s2089_s21 + $0x70] sm:$0xff] %v2146_v38 }
 0x5f2 PF: > { %s25_s10 = sadd.s32 1, %s3039_s10   ;;  %s3934_s30 = sld [smem:[#allocation12_spill]] }
 0x5f3   : > { %p22_p2 = scmp.ge.s32.totalorder %s25_s10, 4   ;;  %s3935_s18 = sld [smem:[#allocation10_spill]] }
 0x5f4   : > { %s3936_s9 = sld [smem:[#allocation11_spill]]  ;;  %s3937_s27 = smov %s3023_s28 }
 0x5f5   : > { %s3938_s28 = smov %s3027_s29  ;;  %24 = sbr.rel (!%p22_p2) target bundleno = 8 (0x8), region = 190 }
 0x5f8   : > { %s3939_s29 = smov %s3934_s30 }
 0x5f9   : > { %s3940_s30 = smov %s3935_s18 }
 0x5fa   :  { %2183 = vsyncpa [#allocation4], 1 }
 0x5fb   :  { %2185 = vsyncpa [#allocation4 + $0x1], 1 }
 0x5fc   :  { %2186 = vsyncpa [#allocation6], 1 }
 0x5fd   :  { %2188 = vsyncpa [#allocation6 + $0x1], 1 }

</bundles_post_ra>
